<compile_context>
chip_gen: v5e
topology: v5e:2x2
jax: 0.10.0
libtpu: 0.0.40
codegen_flags: <defaults>
</compile_context>

<pallas_src>
import functools

import jax
import jax.numpy as jnp
from jax.experimental import pallas as pl
from jax.experimental.pallas import tpu as pltpu  # noqa: F401  (TPU backend)


# ----------------------------- Pallas kernels ------------------------------

def _conv_bn_lrelu_kernel(w_ref, p_ref, g_ref, b_ref, o_ref, *, eps, slope):
    # (C_out, K) @ (K, M) on the MXU, f32 accumulation, default precision.
    y = jnp.dot(w_ref[...], p_ref[...], preferred_element_type=jnp.float32)
    # Train-mode BatchNorm: per-channel batch statistics over the lane axis
    # (M = N*Ho*Wo), fused into the GEMM epilogue.  Biased variance as in PyTorch.
    mean = jnp.mean(y, axis=1, keepdims=True)
    var = jnp.mean(jnp.square(y - mean), axis=1, keepdims=True)
    scale = g_ref[...] * jax.lax.rsqrt(var + eps)
    shift = b_ref[...] - mean * scale
    y = y * scale + shift
    o_ref[...] = jnp.where(y >= 0, y, slope * y)          # LeakyReLU(0.05)


def _conv_tanh_kernel(w_ref, p_ref, o_ref):
    y = jnp.dot(w_ref[...], p_ref[...], preferred_element_type=jnp.float32)
    o_ref[...] = jnp.tanh(y)


def fused_conv_bn_lrelu(w_mat, patches, gamma, beta, *, eps=1e-5, slope=0.05):
    """w_mat: (C_out, K); patches: (K, M) -> leaky_relu(BN(w_mat @ patches)) as (C_out, M)."""
    C_out, K = w_mat.shape
    K2, M = patches.shape
    assert K == K2
    kern = functools.partial(_conv_bn_lrelu_kernel, eps=eps, slope=slope)
    return pl.pallas_call(
        kern,
        grid=(1,),
        in_specs=[pl.BlockSpec((C_out, K), lambda i: (0, 0)),
                  pl.BlockSpec((K, M), lambda i: (0, 0)),
                  pl.BlockSpec((C_out, 1), lambda i: (0, 0)),
                  pl.BlockSpec((C_out, 1), lambda i: (0, 0))],
        out_specs=pl.BlockSpec((C_out, M), lambda i: (0, 0)),
        out_shape=jax.ShapeDtypeStruct((C_out, M), jnp.float32),
    )(w_mat, patches, gamma.reshape(C_out, 1), beta.reshape(C_out, 1))


def fused_conv_tanh(w_mat, patches):
    """w_mat: (C_out, K); patches: (K, M) -> tanh(w_mat @ patches) as (C_out, M)."""
    C_out, K = w_mat.shape
    K2, M = patches.shape
    assert K == K2
    return pl.pallas_call(
        _conv_tanh_kernel,
        grid=(1,),
        in_specs=[pl.BlockSpec((C_out, K), lambda i: (0, 0)),
                  pl.BlockSpec((K, M), lambda i: (0, 0))],
        out_specs=pl.BlockSpec((C_out, M), lambda i: (0, 0)),
        out_shape=jax.ShapeDtypeStruct((C_out, M), jnp.float32),
    )(w_mat, patches)


# ------------------------------- JAX glue -----------------------------------

def im2col_cfirst(x_cnhw, k, stride, pad):
    """(C,N,H,W) -> (C*k*k, N*Ho*Wo). K ordered (c, ki, kj); no transpose needed."""
    C, N, H, W = x_cnhw.shape
    xp = jnp.pad(x_cnhw, ((0, 0), (0, 0), (pad, pad), (pad, pad)))
    Ho = (H + 2 * pad - k) // stride + 1
    Wo = (W + 2 * pad - k) // stride + 1
    cols = [xp[:, :, i:i + stride * Ho:stride, j:j + stride * Wo:stride]
            for i in range(k) for j in range(k)]
    patches = jnp.stack(cols, axis=1)                      # (C, k*k, N, Ho, Wo)
    return patches.reshape(C * k * k, N * Ho * Wo), (N, Ho, Wo)


def dilate_and_pad(x_cnhw, stride, k, pad):
    """Rewrite a ConvTranspose2d(stride, pad) input as an equivalent stride-1 conv input."""
    C, N, H, W = x_cnhw.shape
    Hd, Wd = (H - 1) * stride + 1, (W - 1) * stride + 1
    xd = jnp.zeros((C, N, Hd, Wd), x_cnhw.dtype).at[:, :, ::stride, ::stride].set(x_cnhw)
    pp = k - 1 - pad
    return jnp.pad(xd, ((0, 0), (0, 0), (pp, pp), (pp, pp)))


def deconv_to_conv_weight(w_t):
    """ConvTranspose2d weight (C_in, C_out, k, k) -> equivalent OIHW conv weight."""
    return jnp.transpose(w_t, (1, 0, 2, 3))[:, :, ::-1, ::-1]


def g12_forward(x_nchw, params):
    # Internal layout is channels-first (C, N, H, W) so every fused GEMM output
    # is lane-dense (C_out, M = N*Ho*Wo) and feeds the next layer directly.
    x = jnp.transpose(x_nchw, (1, 0, 2, 3)).astype(jnp.float32)

    def layer(x_cnhw, w_oihw, g, b, k, stride, pad):
        patches, (N, Ho, Wo) = im2col_cfirst(x_cnhw, k, stride, pad)
        C_out = w_oihw.shape[0]
        y = fused_conv_bn_lrelu(w_oihw.reshape(C_out, -1), patches, g, b)
        return y.reshape(C_out, N, Ho, Wo)

    x = layer(x, params["w1"], params["g1"], params["b1"], 4, 2, 1)   # (d,  N, 16, 16)
    x = layer(x, params["w2"], params["g2"], params["b2"], 4, 2, 1)   # (2d, N,  8,  8)
    x = layer(x, params["w3"], params["g3"], params["b3"], 3, 1, 1)   # (2d, N,  8,  8)
    x = layer(x, params["w4"], params["g4"], params["b4"], 3, 1, 1)   # (2d, N,  8,  8)

    # deconv1 + BN + leaky_relu : dilate+pad, then plain stride-1 conv.
    x = layer(dilate_and_pad(x, 2, 4, 1), deconv_to_conv_weight(params["wd1"]),
              params["gd1"], params["bd1"], 4, 1, 0)                  # (d,  N, 16, 16)

    # deconv2 + tanh (no BN).
    xd = dilate_and_pad(x, 2, 4, 1)
    patches, (N, Ho, Wo) = im2col_cfirst(xd, 4, 1, 0)
    w_out = deconv_to_conv_weight(params["wd2"])
    C_out = w_out.shape[0]
    y = fused_conv_tanh(w_out.reshape(C_out, -1), patches).reshape(C_out, N, Ho, Wo)
    return jnp.transpose(y, (1, 0, 2, 3))                             # (N, 3, 32, 32)


# -------------------------- reference (pure JAX) ----------------------------

def ref_forward(x_nchw, params):
    dn = ("NCHW", "OIHW", "NCHW")

    def conv(x, w, stride, pad):
        return jax.lax.conv_general_dilated(
            x, w, (stride, stride), [(pad, pad), (pad, pad)], dimension_numbers=dn)

    def deconv(x, w_t, stride, pad):
        k = w_t.shape[-1]
        w = jnp.transpose(w_t, (1, 0, 2, 3))[:, :, ::-1, ::-1]
        pp = k - 1 - pad
        return jax.lax.conv_general_dilated(
            x, w, (1, 1), [(pp, pp), (pp, pp)], lhs_dilation=(stride, stride),
            dimension_numbers=dn)

    def bn(v, g, b):
        m = jnp.mean(v, axis=(0, 2, 3), keepdims=True)
        var = jnp.var(v, axis=(0, 2, 3), keepdims=True)     # biased, train-mode
        return (v - m) / jnp.sqrt(var + 1e-5) * g.reshape(1, -1, 1, 1) + b.reshape(1, -1, 1, 1)

    def lrelu(v):
        return jnp.where(v >= 0, v, 0.05 * v)

    y = lrelu(bn(conv(x_nchw, params["w1"], 2, 1), params["g1"], params["b1"]))
    y = lrelu(bn(conv(y, params["w2"], 2, 1), params["g2"], params["b2"]))
    y = lrelu(bn(conv(y, params["w3"], 1, 1), params["g3"], params["b3"]))
    y = lrelu(bn(conv(y, params["w4"], 1, 1), params["g4"], params["b4"]))
    y = lrelu(bn(deconv(y, params["wd1"], 2, 1), params["gd1"], params["bd1"]))
    return jnp.tanh(deconv(y, params["wd2"], 2, 1))


# ------------------------------ param init ----------------------------------

def init_params(key, conv_dim=8):
    ks = jax.random.split(key, 12)

    def w(k, shape):
        return 0.02 * jax.random.normal(k, shape, jnp.float32)

    d = conv_dim
    return {
        "w1": w(ks[0], (d, 1, 4, 4)),
        "g1": 1.0 + 0.1 * jax.random.normal(ks[6], (d,), jnp.float32),
        "b1": 0.1 * jax.random.normal(ks[7], (d,), jnp.float32),
        "w2": w(ks[1], (2 * d, d, 4, 4)),
        "g2": 1.0 + 0.1 * jax.random.normal(ks[8], (2 * d,), jnp.float32),
        "b2": 0.1 * jax.random.normal(ks[9], (2 * d,), jnp.float32),
        "w3": w(ks[2], (2 * d, 2 * d, 3, 3)),
        "g3": jnp.ones((2 * d,), jnp.float32),
        "b3": jnp.zeros((2 * d,), jnp.float32),
        "w4": w(ks[3], (2 * d, 2 * d, 3, 3)),
        "g4": jnp.ones((2 * d,), jnp.float32),
        "b4": jnp.zeros((2 * d,), jnp.float32),
        "wd1": w(ks[4], (2 * d, d, 4, 4)),   # ConvTranspose2d weight: (C_in, C_out, k, k)
        "gd1": 1.0 + 0.1 * jax.random.normal(ks[10], (d,), jnp.float32),
        "bd1": 0.1 * jax.random.normal(ks[11], (d,), jnp.float32),
        "wd2": w(ks[5], (d, 3, 4, 4)),       # ConvTranspose2d weight: (C_in, C_out, k, k)
    }


if __name__ == "__main__":
    key = jax.random.PRNGKey(0)
    kx, kp = jax.random.split(key)
    # MNIST-style 32x32 single-channel input (32 -> 16 -> 8 -> 8 -> 8 -> 16 -> 32).
    x = jax.random.normal(kx, (2, 1, 32, 32), jnp.float32)
    params = init_params(kp, conv_dim=8)

    out = jax.jit(g12_forward)(x, params)
    jax.block_until_ready(out)

    ref = ref_forward(x, params)
    assert out.shape == ref.shape == (2, 3, 32, 32), (out.shape, ref.shape)
    assert jnp.allclose(out, ref, atol=2e-2, rtol=2e-2), \
        float(jnp.max(jnp.abs(out - ref)))

    print("KERNEL_OK")
</pallas_src>

<mosaic_0001>
module attributes {stable_mosaic.version = 11 : i64} {
  func.func @_conv_bn_lrelu_kernel(%arg0: i32, %arg1: memref<8x16xf32, #tpu.memory_space<vmem>>, %arg2: memref<16x512xf32, #tpu.memory_space<vmem>>, %arg3: memref<8x1xf32, #tpu.memory_space<vmem>>, %arg4: memref<8x1xf32, #tpu.memory_space<vmem>>, %arg5: memref<8x512xf32, #tpu.memory_space<vmem>>) attributes {dimension_semantics = [#tpu.dimension_semantics<arbitrary>], iteration_bounds = array<i64: 1>, scalar_prefetch = 0 : i64, scratch_operands = 0 : i64, tpu.core_type = #tpu.core_type<tc>, window_params = [{pipeline_mode = #tpu.pipeline_mode<synchronous>, transform_indices = @transform_0, window_bounds = array<i64: 8, 16>}, {pipeline_mode = #tpu.pipeline_mode<synchronous>, transform_indices = @transform_1, window_bounds = array<i64: 16, 512>}, {pipeline_mode = #tpu.pipeline_mode<synchronous>, transform_indices = @transform_2, window_bounds = array<i64: 8, 1>}, {pipeline_mode = #tpu.pipeline_mode<synchronous>, transform_indices = @transform_3, window_bounds = array<i64: 8, 1>}, {pipeline_mode = #tpu.pipeline_mode<synchronous>, transform_indices = @transform_4, window_bounds = array<i64: 8, 512>}]} {
    %c0 = arith.constant 0 : index
    %c0_0 = arith.constant 0 : index
    %0 = vector.load %arg1[%c0, %c0_0] : memref<8x16xf32, #tpu.memory_space<vmem>>, vector<8x16xf32>
    %c0_1 = arith.constant 0 : index
    %c0_2 = arith.constant 0 : index
    %1 = vector.load %arg2[%c0_1, %c0_2] : memref<16x512xf32, #tpu.memory_space<vmem>>, vector<16x512xf32>
    %cst = arith.constant dense<0.000000e+00> : vector<8x512xf32>
    %2 = tpu.matmul %0, %1, %cst {dimension_numbers = #tpu.dot_dimension_numbers<[1], [0], [0], [1], [0, 0, 1, 1], [], []>} : vector<8x16xf32>, vector<16x512xf32>, vector<8x512xf32> -> vector<8x512xf32>
    %cst_3 = arith.constant dense<0.000000e+00> : vector<8xf32>
    %3 = vector.multi_reduction <add>, %2, %cst_3 [1] : vector<8x512xf32> to vector<8xf32>
    %4 = vector.shape_cast %3 : vector<8xf32> to vector<8x1xf32>
    %cst_4 = arith.constant 5.120000e+02 : f32
    %5 = vector.broadcast %cst_4 : f32 to vector<8x1xf32>
    %6 = arith.divf %4, %5 : vector<8x1xf32>
    %7 = vector.broadcast %6 : vector<8x1xf32> to vector<8x512xf32>
    %8 = arith.subf %2, %7 : vector<8x512xf32>
    %9 = arith.mulf %8, %8 : vector<8x512xf32>
    %cst_5 = arith.constant dense<0.000000e+00> : vector<8xf32>
    %10 = vector.multi_reduction <add>, %9, %cst_5 [1] : vector<8x512xf32> to vector<8xf32>
    %11 = vector.shape_cast %10 : vector<8xf32> to vector<8x1xf32>
    %cst_6 = arith.constant 5.120000e+02 : f32
    %12 = vector.broadcast %cst_6 : f32 to vector<8x1xf32>
    %13 = arith.divf %11, %12 : vector<8x1xf32>
    %c0_7 = arith.constant 0 : index
    %c0_8 = arith.constant 0 : index
    %14 = vector.load %arg3[%c0_7, %c0_8] : memref<8x1xf32, #tpu.memory_space<vmem>>, vector<8x1xf32>
    %cst_9 = arith.constant 9.99999974E-6 : f32
    %15 = vector.broadcast %cst_9 : f32 to vector<8x1xf32>
    %16 = arith.addf %13, %15 : vector<8x1xf32>
    %17 = math.rsqrt %16 : vector<8x1xf32>
    %18 = arith.mulf %14, %17 : vector<8x1xf32>
    %c0_10 = arith.constant 0 : index
    %c0_11 = arith.constant 0 : index
    %19 = vector.load %arg4[%c0_10, %c0_11] : memref<8x1xf32, #tpu.memory_space<vmem>>, vector<8x1xf32>
    %20 = arith.mulf %6, %18 : vector<8x1xf32>
    %21 = arith.subf %19, %20 : vector<8x1xf32>
    %22 = vector.broadcast %18 : vector<8x1xf32> to vector<8x512xf32>
    %23 = arith.mulf %2, %22 : vector<8x512xf32>
    %24 = vector.broadcast %21 : vector<8x1xf32> to vector<8x512xf32>
    %25 = arith.addf %23, %24 : vector<8x512xf32>
    %cst_12 = arith.constant 0.000000e+00 : f32
    %26 = vector.broadcast %cst_12 : f32 to vector<8x512xf32>
    %27 = arith.cmpf oge, %25, %26 : vector<8x512xf32>
    %cst_13 = arith.constant 5.000000e-02 : f32
    %28 = vector.broadcast %cst_13 : f32 to vector<8x512xf32>
    %29 = arith.mulf %28, %25 : vector<8x512xf32>
    %30 = arith.select %27, %25, %29 : vector<8x512xi1>, vector<8x512xf32>
    %c0_14 = arith.constant 0 : index
    %c0_15 = arith.constant 0 : index
    %31 = vector.load %arg5[%c0_14, %c0_15] : memref<8x512xf32, #tpu.memory_space<vmem>>, vector<8x512xf32>
    tpu.vector_store %arg5[%c0_14, %c0_15], %30 {strides = array<i32>} : memref<8x512xf32, #tpu.memory_space<vmem>>, vector<8x512xf32>,
    return
  }
  func.func @transform_0(%arg0: i32) -> (i32, i32) {
    %c0_i32 = arith.constant 0 : i32
    %c0_i32_0 = arith.constant 0 : i32
    %c0_i32_1 = arith.constant 0 : i32
    return %c0_i32, %c0_i32_0 : i32, i32
  }
  func.func @transform_1(%arg0: i32) -> (i32, i32) {
    %c0_i32 = arith.constant 0 : i32
    %c0_i32_0 = arith.constant 0 : i32
    %c0_i32_1 = arith.constant 0 : i32
    return %c0_i32, %c0_i32_0 : i32, i32
  }
  func.func @transform_2(%arg0: i32) -> (i32, i32) {
    %c0_i32 = arith.constant 0 : i32
    %c0_i32_0 = arith.constant 0 : i32
    %c0_i32_1 = arith.constant 0 : i32
    return %c0_i32, %c0_i32_0 : i32, i32
  }
  func.func @transform_3(%arg0: i32) -> (i32, i32) {
    %c0_i32 = arith.constant 0 : i32
    %c0_i32_0 = arith.constant 0 : i32
    %c0_i32_1 = arith.constant 0 : i32
    return %c0_i32, %c0_i32_0 : i32, i32
  }
  func.func @transform_4(%arg0: i32) -> (i32, i32) {
    %c0_i32 = arith.constant 0 : i32
    %c0_i32_0 = arith.constant 0 : i32
    %c0_i32_1 = arith.constant 0 : i32
    return %c0_i32, %c0_i32_0 : i32, i32
  }
}

module attributes {stable_mosaic.version = 11 : i64} {
  func.func @_conv_bn_lrelu_kernel(%arg0: i32, %arg1: memref<16x128xf32, #tpu.memory_space<vmem>>, %arg2: memref<128x128xf32, #tpu.memory_space<vmem>>, %arg3: memref<16x1xf32, #tpu.memory_space<vmem>>, %arg4: memref<16x1xf32, #tpu.memory_space<vmem>>, %arg5: memref<16x128xf32, #tpu.memory_space<vmem>>) attributes {dimension_semantics = [#tpu.dimension_semantics<arbitrary>], iteration_bounds = array<i64: 1>, scalar_prefetch = 0 : i64, scratch_operands = 0 : i64, tpu.core_type = #tpu.core_type<tc>, window_params = [{pipeline_mode = #tpu.pipeline_mode<synchronous>, transform_indices = @transform_0, window_bounds = array<i64: 16, 128>}, {pipeline_mode = #tpu.pipeline_mode<synchronous>, transform_indices = @transform_1, window_bounds = array<i64: 128, 128>}, {pipeline_mode = #tpu.pipeline_mode<synchronous>, transform_indices = @transform_2, window_bounds = array<i64: 16, 1>}, {pipeline_mode = #tpu.pipeline_mode<synchronous>, transform_indices = @transform_3, window_bounds = array<i64: 16, 1>}, {pipeline_mode = #tpu.pipeline_mode<synchronous>, transform_indices = @transform_4, window_bounds = array<i64: 16, 128>}]} {
    %c0 = arith.constant 0 : index
    %c0_0 = arith.constant 0 : index
    %0 = vector.load %arg1[%c0, %c0_0] : memref<16x128xf32, #tpu.memory_space<vmem>>, vector<16x128xf32>
    %c0_1 = arith.constant 0 : index
    %c0_2 = arith.constant 0 : index
    %1 = vector.load %arg2[%c0_1, %c0_2] : memref<128x128xf32, #tpu.memory_space<vmem>>, vector<128x128xf32>
    %cst = arith.constant dense<0.000000e+00> : vector<16x128xf32>
    %2 = tpu.matmul %0, %1, %cst {dimension_numbers = #tpu.dot_dimension_numbers<[1], [0], [0], [1], [0, 0, 1, 1], [], []>} : vector<16x128xf32>, vector<128x128xf32>, vector<16x128xf32> -> vector<16x128xf32>
    %cst_3 = arith.constant dense<0.000000e+00> : vector<16xf32>
    %3 = vector.multi_reduction <add>, %2, %cst_3 [1] : vector<16x128xf32> to vector<16xf32>
    %4 = vector.shape_cast %3 : vector<16xf32> to vector<16x1xf32>
    %cst_4 = arith.constant 1.280000e+02 : f32
    %5 = vector.broadcast %cst_4 : f32 to vector<16x1xf32>
    %6 = arith.divf %4, %5 : vector<16x1xf32>
    %7 = vector.broadcast %6 : vector<16x1xf32> to vector<16x128xf32>
    %8 = arith.subf %2, %7 : vector<16x128xf32>
    %9 = arith.mulf %8, %8 : vector<16x128xf32>
    %cst_5 = arith.constant dense<0.000000e+00> : vector<16xf32>
    %10 = vector.multi_reduction <add>, %9, %cst_5 [1] : vector<16x128xf32> to vector<16xf32>
    %11 = vector.shape_cast %10 : vector<16xf32> to vector<16x1xf32>
    %cst_6 = arith.constant 1.280000e+02 : f32
    %12 = vector.broadcast %cst_6 : f32 to vector<16x1xf32>
    %13 = arith.divf %11, %12 : vector<16x1xf32>
    %c0_7 = arith.constant 0 : index
    %c0_8 = arith.constant 0 : index
    %14 = vector.load %arg3[%c0_7, %c0_8] : memref<16x1xf32, #tpu.memory_space<vmem>>, vector<16x1xf32>
    %cst_9 = arith.constant 9.99999974E-6 : f32
    %15 = vector.broadcast %cst_9 : f32 to vector<16x1xf32>
    %16 = arith.addf %13, %15 : vector<16x1xf32>
    %17 = math.rsqrt %16 : vector<16x1xf32>
    %18 = arith.mulf %14, %17 : vector<16x1xf32>
    %c0_10 = arith.constant 0 : index
    %c0_11 = arith.constant 0 : index
    %19 = vector.load %arg4[%c0_10, %c0_11] : memref<16x1xf32, #tpu.memory_space<vmem>>, vector<16x1xf32>
    %20 = arith.mulf %6, %18 : vector<16x1xf32>
    %21 = arith.subf %19, %20 : vector<16x1xf32>
    %22 = vector.broadcast %18 : vector<16x1xf32> to vector<16x128xf32>
    %23 = arith.mulf %2, %22 : vector<16x128xf32>
    %24 = vector.broadcast %21 : vector<16x1xf32> to vector<16x128xf32>
    %25 = arith.addf %23, %24 : vector<16x128xf32>
    %cst_12 = arith.constant 0.000000e+00 : f32
    %26 = vector.broadcast %cst_12 : f32 to vector<16x128xf32>
    %27 = arith.cmpf oge, %25, %26 : vector<16x128xf32>
    %cst_13 = arith.constant 5.000000e-02 : f32
    %28 = vector.broadcast %cst_13 : f32 to vector<16x128xf32>
    %29 = arith.mulf %28, %25 : vector<16x128xf32>
    %30 = arith.select %27, %25, %29 : vector<16x128xi1>, vector<16x128xf32>
    %c0_14 = arith.constant 0 : index
    %c0_15 = arith.constant 0 : index
    %31 = vector.load %arg5[%c0_14, %c0_15] : memref<16x128xf32, #tpu.memory_space<vmem>>, vector<16x128xf32>
    tpu.vector_store %arg5[%c0_14, %c0_15], %30 {strides = array<i32>} : memref<16x128xf32, #tpu.memory_space<vmem>>, vector<16x128xf32>,
    return
  }
  func.func @transform_0(%arg0: i32) -> (i32, i32) {
    %c0_i32 = arith.constant 0 : i32
    %c0_i32_0 = arith.constant 0 : i32
    %c0_i32_1 = arith.constant 0 : i32
    return %c0_i32, %c0_i32_0 : i32, i32
  }
  func.func @transform_1(%arg0: i32) -> (i32, i32) {
    %c0_i32 = arith.constant 0 : i32
    %c0_i32_0 = arith.constant 0 : i32
    %c0_i32_1 = arith.constant 0 : i32
    return %c0_i32, %c0_i32_0 : i32, i32
  }
  func.func @transform_2(%arg0: i32) -> (i32, i32) {
    %c0_i32 = arith.constant 0 : i32
    %c0_i32_0 = arith.constant 0 : i32
    %c0_i32_1 = arith.constant 0 : i32
    return %c0_i32, %c0_i32_0 : i32, i32
  }
  func.func @transform_3(%arg0: i32) -> (i32, i32) {
    %c0_i32 = arith.constant 0 : i32
    %c0_i32_0 = arith.constant 0 : i32
    %c0_i32_1 = arith.constant 0 : i32
    return %c0_i32, %c0_i32_0 : i32, i32
  }
  func.func @transform_4(%arg0: i32) -> (i32, i32) {
    %c0_i32 = arith.constant 0 : i32
    %c0_i32_0 = arith.constant 0 : i32
    %c0_i32_1 = arith.constant 0 : i32
    return %c0_i32, %c0_i32_0 : i32, i32
  }
}

module attributes {stable_mosaic.version = 11 : i64} {
  func.func @_conv_bn_lrelu_kernel(%arg0: i32, %arg1: memref<16x144xf32, #tpu.memory_space<vmem>>, %arg2: memref<144x128xf32, #tpu.memory_space<vmem>>, %arg3: memref<16x1xf32, #tpu.memory_space<vmem>>, %arg4: memref<16x1xf32, #tpu.memory_space<vmem>>, %arg5: memref<16x128xf32, #tpu.memory_space<vmem>>) attributes {dimension_semantics = [#tpu.dimension_semantics<arbitrary>], iteration_bounds = array<i64: 1>, scalar_prefetch = 0 : i64, scratch_operands = 0 : i64, tpu.core_type = #tpu.core_type<tc>, window_params = [{pipeline_mode = #tpu.pipeline_mode<synchronous>, transform_indices = @transform_0, window_bounds = array<i64: 16, 144>}, {pipeline_mode = #tpu.pipeline_mode<synchronous>, transform_indices = @transform_1, window_bounds = array<i64: 144, 128>}, {pipeline_mode = #tpu.pipeline_mode<synchronous>, transform_indices = @transform_2, window_bounds = array<i64: 16, 1>}, {pipeline_mode = #tpu.pipeline_mode<synchronous>, transform_indices = @transform_3, window_bounds = array<i64: 16, 1>}, {pipeline_mode = #tpu.pipeline_mode<synchronous>, transform_indices = @transform_4, window_bounds = array<i64: 16, 128>}]} {
    %c0 = arith.constant 0 : index
    %c0_0 = arith.constant 0 : index
    %0 = vector.load %arg1[%c0, %c0_0] : memref<16x144xf32, #tpu.memory_space<vmem>>, vector<16x144xf32>
    %c0_1 = arith.constant 0 : index
    %c0_2 = arith.constant 0 : index
    %1 = vector.load %arg2[%c0_1, %c0_2] : memref<144x128xf32, #tpu.memory_space<vmem>>, vector<144x128xf32>
    %cst = arith.constant dense<0.000000e+00> : vector<16x128xf32>
    %2 = tpu.matmul %0, %1, %cst {dimension_numbers = #tpu.dot_dimension_numbers<[1], [0], [0], [1], [0, 0, 1, 1], [], []>} : vector<16x144xf32>, vector<144x128xf32>, vector<16x128xf32> -> vector<16x128xf32>
    %cst_3 = arith.constant dense<0.000000e+00> : vector<16xf32>
    %3 = vector.multi_reduction <add>, %2, %cst_3 [1] : vector<16x128xf32> to vector<16xf32>
    %4 = vector.shape_cast %3 : vector<16xf32> to vector<16x1xf32>
    %cst_4 = arith.constant 1.280000e+02 : f32
    %5 = vector.broadcast %cst_4 : f32 to vector<16x1xf32>
    %6 = arith.divf %4, %5 : vector<16x1xf32>
    %7 = vector.broadcast %6 : vector<16x1xf32> to vector<16x128xf32>
    %8 = arith.subf %2, %7 : vector<16x128xf32>
    %9 = arith.mulf %8, %8 : vector<16x128xf32>
    %cst_5 = arith.constant dense<0.000000e+00> : vector<16xf32>
    %10 = vector.multi_reduction <add>, %9, %cst_5 [1] : vector<16x128xf32> to vector<16xf32>
    %11 = vector.shape_cast %10 : vector<16xf32> to vector<16x1xf32>
    %cst_6 = arith.constant 1.280000e+02 : f32
    %12 = vector.broadcast %cst_6 : f32 to vector<16x1xf32>
    %13 = arith.divf %11, %12 : vector<16x1xf32>
    %c0_7 = arith.constant 0 : index
    %c0_8 = arith.constant 0 : index
    %14 = vector.load %arg3[%c0_7, %c0_8] : memref<16x1xf32, #tpu.memory_space<vmem>>, vector<16x1xf32>
    %cst_9 = arith.constant 9.99999974E-6 : f32
    %15 = vector.broadcast %cst_9 : f32 to vector<16x1xf32>
    %16 = arith.addf %13, %15 : vector<16x1xf32>
    %17 = math.rsqrt %16 : vector<16x1xf32>
    %18 = arith.mulf %14, %17 : vector<16x1xf32>
    %c0_10 = arith.constant 0 : index
    %c0_11 = arith.constant 0 : index
    %19 = vector.load %arg4[%c0_10, %c0_11] : memref<16x1xf32, #tpu.memory_space<vmem>>, vector<16x1xf32>
    %20 = arith.mulf %6, %18 : vector<16x1xf32>
    %21 = arith.subf %19, %20 : vector<16x1xf32>
    %22 = vector.broadcast %18 : vector<16x1xf32> to vector<16x128xf32>
    %23 = arith.mulf %2, %22 : vector<16x128xf32>
    %24 = vector.broadcast %21 : vector<16x1xf32> to vector<16x128xf32>
    %25 = arith.addf %23, %24 : vector<16x128xf32>
    %cst_12 = arith.constant 0.000000e+00 : f32
    %26 = vector.broadcast %cst_12 : f32 to vector<16x128xf32>
    %27 = arith.cmpf oge, %25, %26 : vector<16x128xf32>
    %cst_13 = arith.constant 5.000000e-02 : f32
    %28 = vector.broadcast %cst_13 : f32 to vector<16x128xf32>
    %29 = arith.mulf %28, %25 : vector<16x128xf32>
    %30 = arith.select %27, %25, %29 : vector<16x128xi1>, vector<16x128xf32>
    %c0_14 = arith.constant 0 : index
    %c0_15 = arith.constant 0 : index
    %31 = vector.load %arg5[%c0_14, %c0_15] : memref<16x128xf32, #tpu.memory_space<vmem>>, vector<16x128xf32>
    tpu.vector_store %arg5[%c0_14, %c0_15], %30 {strides = array<i32>} : memref<16x128xf32, #tpu.memory_space<vmem>>, vector<16x128xf32>,
    return
  }
  func.func @transform_0(%arg0: i32) -> (i32, i32) {
    %c0_i32 = arith.constant 0 : i32
    %c0_i32_0 = arith.constant 0 : i32
    %c0_i32_1 = arith.constant 0 : i32
    return %c0_i32, %c0_i32_0 : i32, i32
  }
  func.func @transform_1(%arg0: i32) -> (i32, i32) {
    %c0_i32 = arith.constant 0 : i32
    %c0_i32_0 = arith.constant 0 : i32
    %c0_i32_1 = arith.constant 0 : i32
    return %c0_i32, %c0_i32_0 : i32, i32
  }
  func.func @transform_2(%arg0: i32) -> (i32, i32) {
    %c0_i32 = arith.constant 0 : i32
    %c0_i32_0 = arith.constant 0 : i32
    %c0_i32_1 = arith.constant 0 : i32
    return %c0_i32, %c0_i32_0 : i32, i32
  }
  func.func @transform_3(%arg0: i32) -> (i32, i32) {
    %c0_i32 = arith.constant 0 : i32
    %c0_i32_0 = arith.constant 0 : i32
    %c0_i32_1 = arith.constant 0 : i32
    return %c0_i32, %c0_i32_0 : i32, i32
  }
  func.func @transform_4(%arg0: i32) -> (i32, i32) {
    %c0_i32 = arith.constant 0 : i32
    %c0_i32_0 = arith.constant 0 : i32
    %c0_i32_1 = arith.constant 0 : i32
    return %c0_i32, %c0_i32_0 : i32, i32
  }
}

module attributes {stable_mosaic.version = 11 : i64} {
  func.func @_conv_bn_lrelu_kernel(%arg0: i32, %arg1: memref<8x256xf32, #tpu.memory_space<vmem>>, %arg2: memref<256x512xf32, #tpu.memory_space<vmem>>, %arg3: memref<8x1xf32, #tpu.memory_space<vmem>>, %arg4: memref<8x1xf32, #tpu.memory_space<vmem>>, %arg5: memref<8x512xf32, #tpu.memory_space<vmem>>) attributes {dimension_semantics = [#tpu.dimension_semantics<arbitrary>], iteration_bounds = array<i64: 1>, scalar_prefetch = 0 : i64, scratch_operands = 0 : i64, tpu.core_type = #tpu.core_type<tc>, window_params = [{pipeline_mode = #tpu.pipeline_mode<synchronous>, transform_indices = @transform_0, window_bounds = array<i64: 8, 256>}, {pipeline_mode = #tpu.pipeline_mode<synchronous>, transform_indices = @transform_1, window_bounds = array<i64: 256, 512>}, {pipeline_mode = #tpu.pipeline_mode<synchronous>, transform_indices = @transform_2, window_bounds = array<i64: 8, 1>}, {pipeline_mode = #tpu.pipeline_mode<synchronous>, transform_indices = @transform_3, window_bounds = array<i64: 8, 1>}, {pipeline_mode = #tpu.pipeline_mode<synchronous>, transform_indices = @transform_4, window_bounds = array<i64: 8, 512>}]} {
    %c0 = arith.constant 0 : index
    %c0_0 = arith.constant 0 : index
    %0 = vector.load %arg1[%c0, %c0_0] : memref<8x256xf32, #tpu.memory_space<vmem>>, vector<8x256xf32>
    %c0_1 = arith.constant 0 : index
    %c0_2 = arith.constant 0 : index
    %1 = vector.load %arg2[%c0_1, %c0_2] : memref<256x512xf32, #tpu.memory_space<vmem>>, vector<256x512xf32>
    %cst = arith.constant dense<0.000000e+00> : vector<8x512xf32>
    %2 = tpu.matmul %0, %1, %cst {dimension_numbers = #tpu.dot_dimension_numbers<[1], [0], [0], [1], [0, 0, 1, 1], [], []>} : vector<8x256xf32>, vector<256x512xf32>, vector<8x512xf32> -> vector<8x512xf32>
    %cst_3 = arith.constant dense<0.000000e+00> : vector<8xf32>
    %3 = vector.multi_reduction <add>, %2, %cst_3 [1] : vector<8x512xf32> to vector<8xf32>
    %4 = vector.shape_cast %3 : vector<8xf32> to vector<8x1xf32>
    %cst_4 = arith.constant 5.120000e+02 : f32
    %5 = vector.broadcast %cst_4 : f32 to vector<8x1xf32>
    %6 = arith.divf %4, %5 : vector<8x1xf32>
    %7 = vector.broadcast %6 : vector<8x1xf32> to vector<8x512xf32>
    %8 = arith.subf %2, %7 : vector<8x512xf32>
    %9 = arith.mulf %8, %8 : vector<8x512xf32>
    %cst_5 = arith.constant dense<0.000000e+00> : vector<8xf32>
    %10 = vector.multi_reduction <add>, %9, %cst_5 [1] : vector<8x512xf32> to vector<8xf32>
    %11 = vector.shape_cast %10 : vector<8xf32> to vector<8x1xf32>
    %cst_6 = arith.constant 5.120000e+02 : f32
    %12 = vector.broadcast %cst_6 : f32 to vector<8x1xf32>
    %13 = arith.divf %11, %12 : vector<8x1xf32>
    %c0_7 = arith.constant 0 : index
    %c0_8 = arith.constant 0 : index
    %14 = vector.load %arg3[%c0_7, %c0_8] : memref<8x1xf32, #tpu.memory_space<vmem>>, vector<8x1xf32>
    %cst_9 = arith.constant 9.99999974E-6 : f32
    %15 = vector.broadcast %cst_9 : f32 to vector<8x1xf32>
    %16 = arith.addf %13, %15 : vector<8x1xf32>
    %17 = math.rsqrt %16 : vector<8x1xf32>
    %18 = arith.mulf %14, %17 : vector<8x1xf32>
    %c0_10 = arith.constant 0 : index
    %c0_11 = arith.constant 0 : index
    %19 = vector.load %arg4[%c0_10, %c0_11] : memref<8x1xf32, #tpu.memory_space<vmem>>, vector<8x1xf32>
    %20 = arith.mulf %6, %18 : vector<8x1xf32>
    %21 = arith.subf %19, %20 : vector<8x1xf32>
    %22 = vector.broadcast %18 : vector<8x1xf32> to vector<8x512xf32>
    %23 = arith.mulf %2, %22 : vector<8x512xf32>
    %24 = vector.broadcast %21 : vector<8x1xf32> to vector<8x512xf32>
    %25 = arith.addf %23, %24 : vector<8x512xf32>
    %cst_12 = arith.constant 0.000000e+00 : f32
    %26 = vector.broadcast %cst_12 : f32 to vector<8x512xf32>
    %27 = arith.cmpf oge, %25, %26 : vector<8x512xf32>
    %cst_13 = arith.constant 5.000000e-02 : f32
    %28 = vector.broadcast %cst_13 : f32 to vector<8x512xf32>
    %29 = arith.mulf %28, %25 : vector<8x512xf32>
    %30 = arith.select %27, %25, %29 : vector<8x512xi1>, vector<8x512xf32>
    %c0_14 = arith.constant 0 : index
    %c0_15 = arith.constant 0 : index
    %31 = vector.load %arg5[%c0_14, %c0_15] : memref<8x512xf32, #tpu.memory_space<vmem>>, vector<8x512xf32>
    tpu.vector_store %arg5[%c0_14, %c0_15], %30 {strides = array<i32>} : memref<8x512xf32, #tpu.memory_space<vmem>>, vector<8x512xf32>,
    return
  }
  func.func @transform_0(%arg0: i32) -> (i32, i32) {
    %c0_i32 = arith.constant 0 : i32
    %c0_i32_0 = arith.constant 0 : i32
    %c0_i32_1 = arith.constant 0 : i32
    return %c0_i32, %c0_i32_0 : i32, i32
  }
  func.func @transform_1(%arg0: i32) -> (i32, i32) {
    %c0_i32 = arith.constant 0 : i32
    %c0_i32_0 = arith.constant 0 : i32
    %c0_i32_1 = arith.constant 0 : i32
    return %c0_i32, %c0_i32_0 : i32, i32
  }
  func.func @transform_2(%arg0: i32) -> (i32, i32) {
    %c0_i32 = arith.constant 0 : i32
    %c0_i32_0 = arith.constant 0 : i32
    %c0_i32_1 = arith.constant 0 : i32
    return %c0_i32, %c0_i32_0 : i32, i32
  }
  func.func @transform_3(%arg0: i32) -> (i32, i32) {
    %c0_i32 = arith.constant 0 : i32
    %c0_i32_0 = arith.constant 0 : i32
    %c0_i32_1 = arith.constant 0 : i32
    return %c0_i32, %c0_i32_0 : i32, i32
  }
  func.func @transform_4(%arg0: i32) -> (i32, i32) {
    %c0_i32 = arith.constant 0 : i32
    %c0_i32_0 = arith.constant 0 : i32
    %c0_i32_1 = arith.constant 0 : i32
    return %c0_i32, %c0_i32_0 : i32, i32
  }
}

module attributes {stable_mosaic.version = 11 : i64} {
  func.func @_conv_tanh_kernel(%arg0: i32, %arg1: memref<3x128xf32, #tpu.memory_space<vmem>>, %arg2: memref<128x2048xf32, #tpu.memory_space<vmem>>, %arg3: memref<3x2048xf32, #tpu.memory_space<vmem>>) attributes {dimension_semantics = [#tpu.dimension_semantics<arbitrary>], iteration_bounds = array<i64: 1>, scalar_prefetch = 0 : i64, scratch_operands = 0 : i64, tpu.core_type = #tpu.core_type<tc>, window_params = [{pipeline_mode = #tpu.pipeline_mode<synchronous>, transform_indices = @transform_0, window_bounds = array<i64: 3, 128>}, {pipeline_mode = #tpu.pipeline_mode<synchronous>, transform_indices = @transform_1, window_bounds = array<i64: 128, 2048>}, {pipeline_mode = #tpu.pipeline_mode<synchronous>, transform_indices = @transform_2, window_bounds = array<i64: 3, 2048>}]} {
    %c0 = arith.constant 0 : index
    %c0_0 = arith.constant 0 : index
    %0 = vector.load %arg1[%c0, %c0_0] : memref<3x128xf32, #tpu.memory_space<vmem>>, vector<3x128xf32>
    %c0_1 = arith.constant 0 : index
    %c0_2 = arith.constant 0 : index
    %1 = vector.load %arg2[%c0_1, %c0_2] : memref<128x2048xf32, #tpu.memory_space<vmem>>, vector<128x2048xf32>
    %cst = arith.constant dense<0.000000e+00> : vector<3x2048xf32>
    %2 = tpu.matmul %0, %1, %cst {dimension_numbers = #tpu.dot_dimension_numbers<[1], [0], [0], [1], [0, 0, 1, 1], [], []>} : vector<3x128xf32>, vector<128x2048xf32>, vector<3x2048xf32> -> vector<3x2048xf32>
    %3 = math.tanh %2 : vector<3x2048xf32>
    %c0_3 = arith.constant 0 : index
    %c0_4 = arith.constant 0 : index
    %4 = vector.load %arg3[%c0_3, %c0_4] : memref<3x2048xf32, #tpu.memory_space<vmem>>, vector<3x2048xf32>
    tpu.vector_store %arg3[%c0_3, %c0_4], %3 {strides = array<i32>} : memref<3x2048xf32, #tpu.memory_space<vmem>>, vector<3x2048xf32>,
    return
  }
  func.func @transform_0(%arg0: i32) -> (i32, i32) {
    %c0_i32 = arith.constant 0 : i32
    %c0_i32_0 = arith.constant 0 : i32
    %c0_i32_1 = arith.constant 0 : i32
    return %c0_i32, %c0_i32_0 : i32, i32
  }
  func.func @transform_1(%arg0: i32) -> (i32, i32) {
    %c0_i32 = arith.constant 0 : i32
    %c0_i32_0 = arith.constant 0 : i32
    %c0_i32_1 = arith.constant 0 : i32
    return %c0_i32, %c0_i32_0 : i32, i32
  }
  func.func @transform_2(%arg0: i32) -> (i32, i32) {
    %c0_i32 = arith.constant 0 : i32
    %c0_i32_0 = arith.constant 0 : i32
    %c0_i32_1 = arith.constant 0 : i32
    return %c0_i32, %c0_i32_0 : i32, i32
  }
}

</mosaic_0001>

<bundles_post_ra>
// kernel: g12_forward.6
= control target key start
LH: loop header
LB: loop body
LE: loop exit
PB: predicated region body
PF: predicated region fallthrough
CT: control target
= control target key end

     0   :  { %vm26_vm0 = vcmask 130048   ;;  %v203_v16 = vmov 512.0   ;;  %v204_v36 = vmov 0   ;;  %s275_s1 = inlined_call_operand.vmem [shape: f32[16,512], index: 1, kind: input, shape index: {}]   ;;  %s276_s0 = inlined_call_operand.vmem [shape: f32[8,16], index: 0, kind: input, shape index: {}]   ;;  %s277_s2 = inlined_call_operand.vmem [shape: f32[8,1], index: 2, kind: input, shape index: {}]   ;;  %s278_s3 = inlined_call_operand.vmem [shape: f32[8,1], index: 3, kind: input, shape index: {}]   ;;  %s279_s4 = inlined_call_operand.vmem [shape: f32[8,512], index: 4, kind: output, shape index: {}]  }
   0x1   :  { %v24_v0 = vld [vmem:[%s275_s1 + $0x30] sm:$0xff]  ;;  %v25_v2 = vld [vmem:[%s275_s1 + $0x38] sm:$0xff]  ;;  %v17_v3 = vld [vmem:[%s276_s0] sm:$0xff]  ;;  %199 = vrcp.f32 %v203_v16  ;;  %197 = vset.pattern.permute.xlu1 %v204_v36  ;;  %198 = vset.pattern.permute.xlu0 %v204_v36 }
   0x2   :  { %v20_v1 = vld [vmem:[%s275_s1 + $0x10] sm:$0xff]  ;;  %84 = vmatpush.msra.mxu2 %v24_v0  ;;  %104 = vmatpush.msra.mxu3 %v25_v2  ;;  %v22_v4 = vld [vmem:[%s275_s1 + $0x20] sm:$0xff]  ;;  %v23_v5 = vld [vmem:[%s275_s1 + $0x28] sm:$0xff] }
   0x3   :  { %44 = vmatpush.msra.mxu0 %v22_v4  ;;  %64 = vmatpush.msra.mxu1 %v23_v5  ;;  %v21_v6 = vld [vmem:[%s275_s1 + $0x18] sm:$0xff]  ;;  %v18_v7 = vld [vmem:[%s275_s1] sm:$0xff]  ;;  %v19_v8 = vld [vmem:[%s275_s1 + $0x8] sm:$0xff] }
   0x4   :  { %85 = vmatpush.msra.mxu2 %v20_v1  ;;  %105 = vmatpush.msra.mxu3 %v21_v6  ;;  %v137_v45 = vld [vmem:[%s277_s2] sm:$0xff] }
   0x5   :  { %193 = vmatmul.msk.f32.vlgmr.msra.gmra.mxu2 %vm26_vm0, %v17_v3  ;;  %194 = vmatmul.msk.f32.vlgmr.msra.gmra.mxu3 %vm26_vm0, %v17_v3  ;;  %v150_v50 = vld [vmem:[%s278_s3] sm:$0xff] }
   0x6   :  { %45 = vmatpush.msra.mxu0 %v18_v7  ;;  %65 = vmatpush.msra.mxu1 %v19_v8 }
   0x7   :  { %191 = vmatmul.msk.f32.vlgmr.msra.gmra.mxu0 %vm26_vm0, %v17_v3  ;;  %192 = vmatmul.msk.f32.vlgmr.msra.gmra.mxu1 %vm26_vm0, %v17_v3  ;;  %v200_v17 = vpop.eup %199 }
   0x8   :  { %v116_v18 = vmul.f32 512.0, %v200_v17  ;;  %vm120_vm1 = vweird.f32 %v200_v17 }
   0xa   :  { %v117_v19 = vsub.f32 1.0, %v116_v18 }
   0xc   :  { %v118_v20 = vmul.f32 %v200_v17, %v117_v19 }
   0xe   :  { %v119_v21 = vadd.f32 %v200_v17, %v118_v20 }
  0x10   :  { %v121_v22 = vsel %vm120_vm1, %v200_v17, %v119_v21 }
  0x84   :  { %v47_v9 = vpop.f32.mrf.mxu0  ;;  %v67_v10 = vpop.f32.mrf.mxu1 }
  0x85   :  { %v110_v11 = vadd.f32 %v67_v10, %v47_v9 }
  0x88   :  { %v87_v12 = vpop.f32.mrf.mxu2  ;;  %v107_v13 = vpop.f32.mrf.mxu3 }
  0x89   :  { %v111_v14 = vadd.f32 %v110_v11, %v87_v12 }
  0x8b   :  { %v112_v15 = vadd.f32 %v111_v14, %v107_v13 }
  0x8d   :  { %113 = vadd.xlane.f32.xlu0 %v112_v15 }
 0x100   :  { %v114_v23 = vpop.xlane.xlu0 %113 }
 0x101   :  { %v122_v24 = vmul.f32 %v121_v22, %v114_v23 }
 0x103   :  { %v123_v25 = vsub.f32 %v47_v9, %v122_v24  ;;  %v124_v26 = vsub.f32 %v67_v10, %v122_v24  ;;  %v125_v27 = vsub.f32 %v87_v12, %v122_v24  ;;  %v126_v28 = vsub.f32 %v107_v13, %v122_v24 }
 0x105   :  { %v127_v29 = vmul.f32 %v123_v25, %v123_v25  ;;  %v128_v30 = vmul.f32 %v124_v26, %v124_v26  ;;  %v129_v31 = vmul.f32 %v125_v27, %v125_v27  ;;  %v130_v33 = vmul.f32 %v126_v28, %v126_v28 }
 0x107   :  { %v131_v32 = vadd.f32 %v128_v30, %v127_v29 }
 0x109   :  { %v132_v34 = vadd.f32 %v131_v32, %v129_v31 }
 0x10b   :  { %v133_v35 = vadd.f32 %v132_v34, %v130_v33 }
 0x10d   :  { %134 = vadd.xlane.f32.xlu0 %v133_v35 }
 0x180   :  { %v135_v37 = vpop.xlane.xlu0 %134 }
 0x181   :  { %v136_v38 = vmul.f32 %v135_v37, %v121_v22 }
 0x183   :  { %v138_v39 = vadd.f32 1e-05, %v136_v38 }
 0x185   :  { %201 = vrsqrt.f32 %v138_v39  ;;  %vm145_vm3 = vweird.f32 %v138_v39 }
 0x18b   :  { %v202_v40 = vpop.eup %201 }
 0x18c   :  { %v140_v41 = vmul.f32 %v202_v40, %v138_v39  ;;  %vm146_vm2 = vweird.f32 %v202_v40 }
 0x18d   :  { %vm147_vm4 = vmor %vm145_vm3, %vm146_vm2 }
 0x18e   :  { %v141_v42 = vmul.f32 %v202_v40, %v140_v41 }
 0x190   :  { %v142_v43 = vmul.f32 0.5, %v141_v42 }
 0x192   :  { %v143_v44 = vsub.f32 1.5, %v142_v43 }
 0x194   :  { %v144_v46 = vmul.f32 %v202_v40, %v143_v44 }
 0x196   :  { %v148_v47 = vsel %vm147_vm4, %v202_v40, %v144_v46 }
 0x197   :  { %v149_v48 = vmul.f32 %v148_v47, %v137_v45 }
 0x199   :  { %155 = vperm.xlu1 %197, %v149_v48   ;;  %v151_v49 = vmul.f32 %v149_v48, %v122_v24 }
 0x19b   :  { %v152_v51 = vsub.f32 %v150_v50, %v151_v49 }
 0x1a1   :  { %164 = vperm.xlu1 %197, %v152_v51  }
 0x20b   :  { %v156_v52 = vpop.permute.xlu1 %155 }
 0x20c   :  { %v158_v53 = vmul.f32 %v156_v52, %v47_v9  ;;  %v159_v54 = vmul.f32 %v156_v52, %v67_v10  ;;  %v160_v55 = vmul.f32 %v156_v52, %v87_v12  ;;  %v161_v56 = vmul.f32 %v156_v52, %v107_v13 }
 0x213   :  { %v165_v57 = vpop.permute.xlu1 %164 }
 0x214   :  { %v167_v58 = vadd.f32 %v165_v57, %v158_v53  ;;  %v168_v59 = vadd.f32 %v165_v57, %v159_v54  ;;  %v169_v60 = vadd.f32 %v165_v57, %v160_v55  ;;  %v170_v61 = vadd.f32 %v165_v57, %v161_v56 }
 0x216   :  { %vm171_vm5 = vcmp.ge.f32.partialorder %v167_v58, 0.0  ;;  %vm172_vm6 = vcmp.ge.f32.partialorder %v168_v59, 0.0  ;;  %vm173_vm7 = vcmp.ge.f32.partialorder %v169_v60, 0.0  ;;  %vm174_vm8 = vcmp.ge.f32.partialorder %v170_v61, 0.0 }
 0x217   :  { %v175_v62 = vmul.f32 0.05, %v167_v58  ;;  %v176_v63 = vmul.f32 0.05, %v168_v59  ;;  %v177_v0 = vmul.f32 0.05, %v169_v60 }
 0x218   :  { %v178_v1 = vmul.f32 0.05, %v170_v61 }
 0x219   :  { %v179_v2 = vsel %vm171_vm5, %v167_v58, %v175_v62  ;;  %v180_v3 = vsel %vm172_vm6, %v168_v59, %v176_v63  ;;  %v181_v4 = vsel %vm173_vm7, %v169_v60, %v177_v0 }
 0x21a   :  { %v182_v5 = vsel %vm174_vm8, %v170_v61, %v178_v1  ;;  %183 = vst [vmem:[%s279_s4] sm:$0xff] %v179_v2 }
 0x21b   :  { %184 = vst [vmem:[%s279_s4 + $0x8] sm:$0xff] %v180_v3 }
 0x21c   :  { %185 = vst [vmem:[%s279_s4 + $0x10] sm:$0xff] %v181_v4 }
 0x21d   :  { %186 = vst [vmem:[%s279_s4 + $0x18] sm:$0xff] %v182_v5 }

// kernel: g12_forward.7
= control target key start
LH: loop header
LB: loop body
LE: loop exit
PB: predicated region body
PF: predicated region fallthrough
CT: control target
= control target key end

     0   :  { %v176_v20 = vmov 128.0   ;;  %v177_v35 = vmov 0   ;;  %s285_s1 = inlined_call_operand.vmem [shape: f32[128,128], index: 1, kind: input, shape index: {}]   ;;  %s286_s0 = inlined_call_operand.vmem [shape: f32[16,128], index: 0, kind: input, shape index: {}]   ;;  %s287_s2 = inlined_call_operand.vmem [shape: f32[16,1], index: 2, kind: input, shape index: {}]   ;;  %s288_s3 = inlined_call_operand.vmem [shape: f32[16,1], index: 3, kind: input, shape index: {}]   ;;  %s289_s4 = inlined_call_operand.vmem [shape: f32[16,128], index: 4, kind: output, shape index: {}]  }
   0x1   :  { %v34_v0 = vld [vmem:[%s285_s1 + $0x78] sm:$0xff]  ;;  %v33_v1 = vld [vmem:[%s285_s1 + $0x70] sm:$0xff]  ;;  %v32_v2 = vld [vmem:[%s285_s1 + $0x68] sm:$0xff]  ;;  %170 = vrcp.f32 %v176_v20  ;;  %167 = vset.pattern.permute.xlu2 %v177_v35  ;;  %168 = vset.pattern.permute.xlu0 %v177_v35 }
   0x2   :  { %35 = vmatpush.msra.mxu0 %v34_v0  ;;  %149 = vmatpush.msra.mxu1 %v34_v0  ;;  %v31_v3 = vld [vmem:[%s285_s1 + $0x60] sm:$0xff]  ;;  %v30_v4 = vld [vmem:[%s285_s1 + $0x58] sm:$0xff]  ;;  %v29_v5 = vld [vmem:[%s285_s1 + $0x50] sm:$0xff] }
   0x3   :  { %v28_v6 = vld [vmem:[%s285_s1 + $0x48] sm:$0xff]  ;;  %v27_v7 = vld [vmem:[%s285_s1 + $0x40] sm:$0xff]  ;;  %v26_v8 = vld [vmem:[%s285_s1 + $0x38] sm:$0xff]  ;;  %169 = vset.pattern.permute.xlu1 %v177_v35 }
   0x4   :  { %36 = vmatpush.msra.mxu0 %v33_v1  ;;  %150 = vmatpush.msra.mxu1 %v33_v1  ;;  %v25_v9 = vld [vmem:[%s285_s1 + $0x30] sm:$0xff]  ;;  %v24_v10 = vld [vmem:[%s285_s1 + $0x28] sm:$0xff]  ;;  %v23_v11 = vld [vmem:[%s285_s1 + $0x20] sm:$0xff] }
   0x5   :  { %v22_v12 = vld [vmem:[%s285_s1 + $0x18] sm:$0xff]  ;;  %v21_v13 = vld [vmem:[%s285_s1 + $0x10] sm:$0xff]  ;;  %v20_v14 = vld [vmem:[%s285_s1 + $0x8] sm:$0xff] }
   0x6   :  { %37 = vmatpush.msra.mxu0 %v32_v2  ;;  %151 = vmatpush.msra.mxu1 %v32_v2  ;;  %v19_v15 = vld [vmem:[%s285_s1] sm:$0xff]  ;;  %v18_v17 = vld [vmem:[%s286_s0 + $0x8] sm:$0xff] }
   0x7   :  { %v17_v16 = vld [vmem:[%s286_s0] sm:$0xff]  ;;  %v171_v21 = vpop.eup %170  ;;  %v82_v59 = vld [vmem:[%s287_s2 + $0x8] sm:$0xff] }
   0x8   :  { %38 = vmatpush.msra.mxu0 %v31_v3  ;;  %152 = vmatpush.msra.mxu1 %v31_v3  ;;  %v63_v22 = vmul.f32 128.0, %v171_v21  ;;  %vm67_vm0 = vweird.f32 %v171_v21  ;;  %v81_v49 = vld [vmem:[%s287_s2] sm:$0xff]  ;;  %v108_v63 = vld [vmem:[%s288_s3 + $0x8] sm:$0xff] }
   0x9   :  { %v107_v55 = vld [vmem:[%s288_s3] sm:$0xff] }
   0xa   :  { %39 = vmatpush.msra.mxu0 %v30_v4  ;;  %153 = vmatpush.msra.mxu1 %v30_v4  ;;  %v64_v23 = vsub.f32 1.0, %v63_v22 }
   0xc   :  { %40 = vmatpush.msra.mxu0 %v29_v5  ;;  %154 = vmatpush.msra.mxu1 %v29_v5  ;;  %v65_v24 = vmul.f32 %v171_v21, %v64_v23 }
   0xe   :  { %41 = vmatpush.msra.mxu0 %v28_v6  ;;  %155 = vmatpush.msra.mxu1 %v28_v6  ;;  %v66_v25 = vadd.f32 %v171_v21, %v65_v24 }
  0x10   :  { %42 = vmatpush.msra.mxu0 %v27_v7  ;;  %156 = vmatpush.msra.mxu1 %v27_v7  ;;  %v68_v26 = vsel %vm67_vm0, %v171_v21, %v66_v25 }
  0x12   :  { %43 = vmatpush.msra.mxu0 %v26_v8  ;;  %157 = vmatpush.msra.mxu1 %v26_v8 }
  0x14   :  { %44 = vmatpush.msra.mxu0 %v25_v9  ;;  %158 = vmatpush.msra.mxu1 %v25_v9 }
  0x16   :  { %45 = vmatpush.msra.mxu0 %v24_v10  ;;  %159 = vmatpush.msra.mxu1 %v24_v10 }
  0x18   :  { %46 = vmatpush.msra.mxu0 %v23_v11  ;;  %160 = vmatpush.msra.mxu1 %v23_v11 }
  0x1a   :  { %47 = vmatpush.msra.mxu0 %v22_v12  ;;  %161 = vmatpush.msra.mxu1 %v22_v12 }
  0x1c   :  { %48 = vmatpush.msra.mxu0 %v21_v13  ;;  %162 = vmatpush.msra.mxu1 %v21_v13 }
  0x1e   :  { %49 = vmatpush.msra.mxu0 %v20_v14  ;;  %163 = vmatpush.msra.mxu1 %v20_v14 }
  0x20   :  { %50 = vmatpush.msra.mxu0 %v19_v15  ;;  %164 = vmatpush.msra.mxu1 %v19_v15 }
  0x21   :  { %51 = vmatmul.f32.vlgmr.msra.gmra.mxu0 %v17_v16  ;;  %54 = vmatmul.f32.vlgmr.msra.gmra.mxu1 %v18_v17 }
  0x9e   :  { %v257_v18 = vpop.f32.mrf.mxu0  ;;  %v260_v19 = vpop.f32.mrf.mxu1 }
  0x9f   :  { %58 = vadd.xlane.f32.xlu0 %v257_v18 }
  0xa7   :  { %60 = vadd.xlane.f32.xlu0 %v260_v19 }
 0x112   :  { %v59_v27 = vpop.xlane.xlu0 %58 }
 0x113   :  { %v69_v28 = vmul.f32 %v68_v26, %v59_v27 }
 0x115   :  { %v71_v29 = vsub.f32 %v257_v18, %v69_v28 }
 0x117   :  { %v73_v30 = vmul.f32 %v71_v29, %v71_v29 }
 0x119   :  { %75 = vadd.xlane.f32.xlu1 %v73_v30 }
 0x11a   :  { %v61_v31 = vpop.xlane.xlu0 %60 }
 0x11b   :  { %v70_v32 = vmul.f32 %v68_v26, %v61_v31 }
 0x11d   :  { %v72_v33 = vsub.f32 %v260_v19, %v70_v32 }
 0x11f   :  { %v74_v34 = vmul.f32 %v72_v33, %v72_v33 }
 0x121   :  { %77 = vadd.xlane.f32.xlu1 %v74_v34 }
 0x18c   :  { %v76_v36 = vpop.xlane.xlu1 %75 }
 0x18d   :  { %v79_v37 = vmul.f32 %v76_v36, %v68_v26 }
 0x18f   :  { %v83_v38 = vadd.f32 1e-05, %v79_v37 }
 0x191   :  { %172 = vrsqrt.f32 %v83_v38  ;;  %vm91_vm2 = vweird.f32 %v83_v38 }
 0x194   :  { %v78_v39 = vpop.xlane.xlu1 %77 }
 0x195   :  { %v80_v40 = vmul.f32 %v78_v39, %v68_v26 }
 0x197   :  { %v173_v41 = vpop.eup %172  ;;  %v84_v42 = vadd.f32 1e-05, %v80_v40 }
 0x198   :  { %v86_v43 = vmul.f32 %v173_v41, %v83_v38  ;;  %vm92_vm1 = vweird.f32 %v173_v41 }
 0x199   :  { %174 = vrsqrt.f32 %v84_v42  ;;  %vm93_vm3 = vmor %vm91_vm2, %vm92_vm1  ;;  %vm101_vm5 = vweird.f32 %v84_v42 }
 0x19a   :  { %v87_v44 = vmul.f32 %v173_v41, %v86_v43 }
 0x19c   :  { %v88_v45 = vmul.f32 0.5, %v87_v44 }
 0x19e   :  { %v89_v46 = vsub.f32 1.5, %v88_v45 }
 0x19f   :  { %v175_v47 = vpop.eup %174 }
 0x1a0   :  { %v96_v48 = vmul.f32 %v175_v47, %v84_v42  ;;  %v90_v50 = vmul.f32 %v173_v41, %v89_v46  ;;  %vm102_vm4 = vweird.f32 %v175_v47 }
 0x1a1   :  { %vm103_vm6 = vmor %vm101_vm5, %vm102_vm4 }
 0x1a2   :  { %v97_v51 = vmul.f32 %v175_v47, %v96_v48  ;;  %v94_v52 = vsel %vm93_vm3, %v173_v41, %v90_v50 }
 0x1a3   :  { %v105_v53 = vmul.f32 %v94_v52, %v81_v49 }
 0x1a4   :  { %v98_v54 = vmul.f32 0.5, %v97_v51 }
 0x1a5   :  { %115 = vperm.xlu2 %167, %v105_v53   ;;  %v109_v56 = vmul.f32 %v105_v53, %v69_v28 }
 0x1a6   :  { %v99_v57 = vsub.f32 1.5, %v98_v54 }
 0x1a7   :  { %v111_v58 = vsub.f32 %v107_v55, %v109_v56 }
 0x1a8   :  { %v100_v60 = vmul.f32 %v175_v47, %v99_v57 }
 0x1a9   :  { %127 = vperm.xlu0 %168, %v111_v58  }
 0x1aa   :  { %v104_v61 = vsel %vm103_vm6, %v175_v47, %v100_v60 }
 0x1ab   :  { %v106_v62 = vmul.f32 %v104_v61, %v82_v59 }
 0x1ad   :  { %120 = vperm.xlu2 %167, %v106_v62   ;;  %v110_v0 = vmul.f32 %v106_v62, %v70_v32 }
 0x1af   :  { %v112_v1 = vsub.f32 %v108_v63, %v110_v0 }
 0x1b1   :  { %132 = vperm.xlu1 %169, %v112_v1  }
 0x1ff   :  { %v116_v2 = vpop.permute.xlu2 %115 }
 0x200   :  { %v123_v3 = vmul.f32 %v116_v2, %v257_v18 }
 0x207   :  { %v121_v7 = vpop.permute.xlu2 %120 }
 0x208   :  { %v124_v9 = vmul.f32 %v121_v7, %v260_v19 }
 0x21b   :  { %v128_v4 = vpop.permute.xlu0 %127 }
 0x21c   :  { %v135_v5 = vadd.f32 %v128_v4, %v123_v3 }
 0x21e   :  { %vm137_vm7 = vcmp.ge.f32.partialorder %v135_v5, 0.0  ;;  %v139_v6 = vmul.f32 0.05, %v135_v5 }
 0x220   :  { %v141_v8 = vsel %vm137_vm7, %v135_v5, %v139_v6 }
 0x221   :  { %143 = vst [vmem:[%s289_s4] sm:$0xff] %v141_v8 }
 0x223   :  { %v133_v10 = vpop.permute.xlu1 %132 }
 0x224   :  { %v136_v11 = vadd.f32 %v133_v10, %v124_v9 }
 0x226   :  { %vm138_vm8 = vcmp.ge.f32.partialorder %v136_v11, 0.0  ;;  %v140_v12 = vmul.f32 0.05, %v136_v11 }
 0x228   :  { %v142_v13 = vsel %vm138_vm8, %v136_v11, %v140_v12 }
 0x229   :  { %144 = vst [vmem:[%s289_s4 + $0x8] sm:$0xff] %v142_v13 }

// kernel: g12_forward.8
= control target key start
LH: loop header
LB: loop body
LE: loop exit
PB: predicated region body
PF: predicated region fallthrough
CT: control target
= control target key end

     0   :  { %vm39_vm0 = vcmask 130048   ;;  %v212_v28 = vmov 128.0   ;;  %v213_v43 = vmov 0   ;;  %s335_s1 = inlined_call_operand.vmem [shape: f32[144,128], index: 1, kind: input, shape index: {}]   ;;  %s336_s0 = inlined_call_operand.vmem [shape: f32[16,144], index: 0, kind: input, shape index: {}]   ;;  %s337_s2 = inlined_call_operand.vmem [shape: f32[16,1], index: 2, kind: input, shape index: {}]   ;;  %s338_s3 = inlined_call_operand.vmem [shape: f32[16,1], index: 3, kind: input, shape index: {}]   ;;  %s339_s4 = inlined_call_operand.vmem [shape: f32[16,128], index: 4, kind: output, shape index: {}]  }
   0x1   :  { %v36_v0 = vld [vmem:[%s335_s1 + $0x78] sm:$0xff]  ;;  %v35_v1 = vld [vmem:[%s335_s1 + $0x70] sm:$0xff]  ;;  %v34_v2 = vld [vmem:[%s335_s1 + $0x68] sm:$0xff]  ;;  %206 = vrcp.f32 %v212_v28  ;;  %203 = vset.pattern.permute.xlu2 %v213_v43  ;;  %204 = vset.pattern.permute.xlu0 %v213_v43 }
   0x2   :  { %46 = vmatpush.msra.mxu0 %v36_v0  ;;  %185 = vmatpush.msra.mxu2 %v36_v0  ;;  %v33_v3 = vld [vmem:[%s335_s1 + $0x60] sm:$0xff]  ;;  %v38_v4 = vld [vmem:[%s335_s1 + $0x88] sm:$0xff]  ;;  %v32_v6 = vld [vmem:[%s335_s1 + $0x58] sm:$0xff] }
   0x3   :  { %v37_v5 = vld [vmem:[%s335_s1 + $0x80] sm:$0xff]  ;;  %83 = vmatpush.msra.mxu1 %v38_v4  ;;  %v18_v7 = vld [vmem:[%s336_s0 + $0x8] sm:$0xff]  ;;  %v31_v8 = vld [vmem:[%s335_s1 + $0x50] sm:$0xff]  ;;  %205 = vset.pattern.permute.xlu1 %v213_v43 }
   0x4   :  { %47 = vmatpush.msra.mxu0 %v35_v1  ;;  %186 = vmatpush.msra.mxu2 %v35_v1  ;;  %v30_v9 = vld [vmem:[%s335_s1 + $0x48] sm:$0xff]  ;;  %v29_v10 = vld [vmem:[%s335_s1 + $0x40] sm:$0xff]  ;;  %v28_v11 = vld [vmem:[%s335_s1 + $0x38] sm:$0xff] }
   0x5   :  { %84 = vmatpush.msra.mxu1 %v37_v5  ;;  %v20_v12 = vld [vmem:[%s336_s0 + $0x18] sm:$0xff]  ;;  %v27_v13 = vld [vmem:[%s335_s1 + $0x30] sm:$0xff]  ;;  %v26_v14 = vld [vmem:[%s335_s1 + $0x28] sm:$0xff] }
   0x6   :  { %48 = vmatpush.msra.mxu0 %v34_v2  ;;  %187 = vmatpush.msra.mxu2 %v34_v2  ;;  %v25_v15 = vld [vmem:[%s335_s1 + $0x20] sm:$0xff]  ;;  %v24_v16 = vld [vmem:[%s335_s1 + $0x18] sm:$0xff]  ;;  %v23_v17 = vld [vmem:[%s335_s1 + $0x10] sm:$0xff] }
   0x7   :  { %183 = vmatmul.msk.f32.vlgmr.msra.gmra.mxu1 %vm39_vm0, %v18_v7  ;;  %v22_v18 = vld [vmem:[%s335_s1 + $0x8] sm:$0xff]  ;;  %v21_v19 = vld [vmem:[%s335_s1] sm:$0xff]  ;;  %v19_v21 = vld [vmem:[%s336_s0 + $0x10] sm:$0xff]  ;;  %v207_v29 = vpop.eup %206 }
   0x8   :  { %49 = vmatpush.msra.mxu0 %v33_v3  ;;  %188 = vmatpush.msra.mxu2 %v33_v3  ;;  %v17_v20 = vld [vmem:[%s336_s0] sm:$0xff]  ;;  %v97_v30 = vmul.f32 128.0, %v207_v29  ;;  %vm101_vm1 = vweird.f32 %v207_v29  ;;  %v116_v3 = vld [vmem:[%s337_s2 + $0x8] sm:$0xff] }
   0x9   :  { %v115_v57 = vld [vmem:[%s337_s2] sm:$0xff]  ;;  %v142_v7 = vld [vmem:[%s338_s3 + $0x8] sm:$0xff] }
   0xa   :  { %50 = vmatpush.msra.mxu0 %v32_v6  ;;  %189 = vmatpush.msra.mxu2 %v32_v6  ;;  %v98_v31 = vsub.f32 1.0, %v97_v30  ;;  %v141_v63 = vld [vmem:[%s338_s3] sm:$0xff] }
   0xc   :  { %51 = vmatpush.msra.mxu0 %v31_v8  ;;  %190 = vmatpush.msra.mxu2 %v31_v8  ;;  %v99_v32 = vmul.f32 %v207_v29, %v98_v31 }
   0xe   :  { %52 = vmatpush.msra.mxu0 %v30_v9  ;;  %191 = vmatpush.msra.mxu2 %v30_v9  ;;  %v100_v33 = vadd.f32 %v207_v29, %v99_v32 }
   0xf   :  { %184 = vmatmul.msk.f32.gmra.mxu1 %vm39_vm0, %v20_v12 }
  0x10   :  { %53 = vmatpush.msra.mxu0 %v29_v10  ;;  %192 = vmatpush.msra.mxu2 %v29_v10  ;;  %v102_v34 = vsel %vm101_vm1, %v207_v29, %v100_v33 }
  0x12   :  { %54 = vmatpush.msra.mxu0 %v28_v11  ;;  %193 = vmatpush.msra.mxu2 %v28_v11 }
  0x14   :  { %55 = vmatpush.msra.mxu0 %v27_v13  ;;  %194 = vmatpush.msra.mxu2 %v27_v13 }
  0x16   :  { %56 = vmatpush.msra.mxu0 %v26_v14  ;;  %195 = vmatpush.msra.mxu2 %v26_v14 }
  0x18   :  { %57 = vmatpush.msra.mxu0 %v25_v15  ;;  %196 = vmatpush.msra.mxu2 %v25_v15 }
  0x1a   :  { %58 = vmatpush.msra.mxu0 %v24_v16  ;;  %197 = vmatpush.msra.mxu2 %v24_v16 }
  0x1c   :  { %59 = vmatpush.msra.mxu0 %v23_v17  ;;  %198 = vmatpush.msra.mxu2 %v23_v17 }
  0x1e   :  { %60 = vmatpush.msra.mxu0 %v22_v18  ;;  %199 = vmatpush.msra.mxu2 %v22_v18 }
  0x20   :  { %61 = vmatpush.msra.mxu0 %v21_v19  ;;  %200 = vmatpush.msra.mxu2 %v21_v19 }
  0x21   :  { %62 = vmatmul.f32.vlgmr.msra.gmra.mxu0 %v17_v20  ;;  %65 = vmatmul.f32.vlgmr.msra.gmra.mxu2 %v19_v21 }
  0x84   :  { %v86_v22 = vpop.f32.mrf.mxu1 }
  0x8c   :  { %v89_v25 = vpop.f32.mrf.mxu1 }
  0x9e   :  { %v63_v23 = vpop.f32.mrf.mxu0 }
  0x9f   :  { %v307_v24 = vadd.f32 %v86_v22, %v63_v23 }
  0xa1   :  { %92 = vadd.xlane.f32.xlu0 %v307_v24 }
  0xa4   :  { %v66_v26 = vpop.f32.mrf.mxu2 }
  0xa5   :  { %v310_v27 = vadd.f32 %v89_v25, %v66_v26 }
  0xa9   :  { %94 = vadd.xlane.f32.xlu0 %v310_v27 }
 0x114   :  { %v93_v35 = vpop.xlane.xlu0 %92 }
 0x115   :  { %v103_v36 = vmul.f32 %v102_v34, %v93_v35 }
 0x117   :  { %v105_v37 = vsub.f32 %v307_v24, %v103_v36 }
 0x119   :  { %v107_v38 = vmul.f32 %v105_v37, %v105_v37 }
 0x11b   :  { %109 = vadd.xlane.f32.xlu1 %v107_v38 }
 0x11c   :  { %v95_v39 = vpop.xlane.xlu0 %94 }
 0x11d   :  { %v104_v40 = vmul.f32 %v102_v34, %v95_v39 }
 0x11f   :  { %v106_v41 = vsub.f32 %v310_v27, %v104_v40 }
 0x121   :  { %v108_v42 = vmul.f32 %v106_v41, %v106_v41 }
 0x123   :  { %111 = vadd.xlane.f32.xlu1 %v108_v42 }
 0x18e   :  { %v110_v44 = vpop.xlane.xlu1 %109 }
 0x18f   :  { %v113_v45 = vmul.f32 %v110_v44, %v102_v34 }
 0x191   :  { %v117_v46 = vadd.f32 1e-05, %v113_v45 }
 0x193   :  { %208 = vrsqrt.f32 %v117_v46  ;;  %vm125_vm3 = vweird.f32 %v117_v46 }
 0x196   :  { %v112_v47 = vpop.xlane.xlu1 %111 }
 0x197   :  { %v114_v48 = vmul.f32 %v112_v47, %v102_v34 }
 0x199   :  { %v209_v49 = vpop.eup %208  ;;  %v118_v50 = vadd.f32 1e-05, %v114_v48 }
 0x19a   :  { %v120_v51 = vmul.f32 %v209_v49, %v117_v46  ;;  %vm126_vm2 = vweird.f32 %v209_v49 }
 0x19b   :  { %210 = vrsqrt.f32 %v118_v50  ;;  %vm127_vm4 = vmor %vm125_vm3, %vm126_vm2  ;;  %vm135_vm6 = vweird.f32 %v118_v50 }
 0x19c   :  { %v121_v52 = vmul.f32 %v209_v49, %v120_v51 }
 0x19e   :  { %v122_v53 = vmul.f32 0.5, %v121_v52 }
 0x1a0   :  { %v123_v54 = vsub.f32 1.5, %v122_v53 }
 0x1a1   :  { %v211_v55 = vpop.eup %210 }
 0x1a2   :  { %v130_v56 = vmul.f32 %v211_v55, %v118_v50  ;;  %v124_v58 = vmul.f32 %v209_v49, %v123_v54  ;;  %vm136_vm5 = vweird.f32 %v211_v55 }
 0x1a3   :  { %vm137_vm7 = vmor %vm135_vm6, %vm136_vm5 }
 0x1a4   :  { %v131_v59 = vmul.f32 %v211_v55, %v130_v56  ;;  %v128_v60 = vsel %vm127_vm4, %v209_v49, %v124_v58 }
 0x1a5   :  { %v139_v61 = vmul.f32 %v128_v60, %v115_v57 }
 0x1a6   :  { %v132_v62 = vmul.f32 0.5, %v131_v59 }
 0x1a7   :  { %149 = vperm.xlu2 %203, %v139_v61   ;;  %v143_v0 = vmul.f32 %v139_v61, %v103_v36 }
 0x1a8   :  { %v133_v1 = vsub.f32 1.5, %v132_v62 }
 0x1a9   :  { %v145_v2 = vsub.f32 %v141_v63, %v143_v0 }
 0x1aa   :  { %v134_v4 = vmul.f32 %v211_v55, %v133_v1 }
 0x1ab   :  { %161 = vperm.xlu0 %204, %v145_v2  }
 0x1ac   :  { %v138_v5 = vsel %vm137_vm7, %v211_v55, %v134_v4 }
 0x1ad   :  { %v140_v6 = vmul.f32 %v138_v5, %v116_v3 }
 0x1af   :  { %154 = vperm.xlu2 %203, %v140_v6   ;;  %v144_v8 = vmul.f32 %v140_v6, %v104_v40 }
 0x1b1   :  { %v146_v9 = vsub.f32 %v142_v7, %v144_v8 }
 0x1b3   :  { %166 = vperm.xlu1 %205, %v146_v9  }
 0x201   :  { %v150_v10 = vpop.permute.xlu2 %149 }
 0x202   :  { %v157_v11 = vmul.f32 %v150_v10, %v307_v24 }
 0x209   :  { %v155_v15 = vpop.permute.xlu2 %154 }
 0x20a   :  { %v158_v17 = vmul.f32 %v155_v15, %v310_v27 }
 0x21d   :  { %v162_v12 = vpop.permute.xlu0 %161 }
 0x21e   :  { %v169_v13 = vadd.f32 %v162_v12, %v157_v11 }
 0x220   :  { %vm171_vm8 = vcmp.ge.f32.partialorder %v169_v13, 0.0  ;;  %v173_v14 = vmul.f32 0.05, %v169_v13 }
 0x222   :  { %v175_v16 = vsel %vm171_vm8, %v169_v13, %v173_v14 }
 0x223   :  { %177 = vst [vmem:[%s339_s4] sm:$0xff] %v175_v16 }
 0x225   :  { %v167_v18 = vpop.permute.xlu1 %166 }
 0x226   :  { %v170_v19 = vadd.f32 %v167_v18, %v158_v17 }
 0x228   :  { %vm172_vm9 = vcmp.ge.f32.partialorder %v170_v19, 0.0  ;;  %v174_v20 = vmul.f32 0.05, %v170_v19 }
 0x22a   :  { %v176_v21 = vsel %vm172_vm9, %v170_v19, %v174_v20 }
 0x22b   :  { %178 = vst [vmem:[%s339_s4 + $0x8] sm:$0xff] %v176_v21 }

// kernel: g12_forward.10
= control target key start
LH: loop header
LB: loop body
LE: loop exit
PB: predicated region body
PF: predicated region fallthrough
CT: control target
= control target key end

     0   :  { %s831_s1 = inlined_call_operand.vmem [shape: f32[256,512], index: 1, kind: input, shape index: {}]   ;;  %s832_s0 = inlined_call_operand.vmem [shape: f32[8,256], index: 0, kind: input, shape index: {}]   ;;  %s833_s2 = inlined_call_operand.vmem [shape: f32[8,1], index: 2, kind: input, shape index: {}]   ;;  %s834_s3 = inlined_call_operand.vmem [shape: f32[8,1], index: 3, kind: input, shape index: {}]   ;;  %s835_s4 = inlined_call_operand.vmem [shape: f32[8,512], index: 4, kind: output, shape index: {}]  }
   0x1   :  { %v79_v0 = vld [vmem:[%s831_s1 + $0x1e0] sm:$0xff]  ;;  %v80_v2 = vld [vmem:[%s831_s1 + $0x1e8] sm:$0xff] }
   0x2   :  { %v143_v1 = vld [vmem:[%s831_s1 + $0x3e0] sm:$0xff]  ;;  %147 = vmatpush.msra.mxu0 %v79_v0  ;;  %v144_v3 = vld [vmem:[%s831_s1 + $0x3e8] sm:$0xff]  ;;  %187 = vmatpush.msra.mxu2 %v80_v2  ;;  %v81_v0 = vld [vmem:[%s831_s1 + $0x1f0] sm:$0xff] }
   0x3   :  { %167 = vmatpush.msra.mxu1 %v143_v1  ;;  %v75_v4 = vld [vmem:[%s831_s1 + $0x1c0] sm:$0xff]  ;;  %207 = vmatpush.msra.mxu3 %v144_v3  ;;  %v76_v6 = vld [vmem:[%s831_s1 + $0x1c8] sm:$0xff]  ;;  %v145_v1 = vld [vmem:[%s831_s1 + $0x3f0] sm:$0xff] }
   0x4   :  { %v139_v5 = vld [vmem:[%s831_s1 + $0x3c0] sm:$0xff]  ;;  %v140_v7 = vld [vmem:[%s831_s1 + $0x3c8] sm:$0xff]  ;;  %148 = vmatpush.msra.mxu0 %v75_v4  ;;  %188 = vmatpush.msra.mxu2 %v76_v6  ;;  %v82_v2 = vld [vmem:[%s831_s1 + $0x1f8] sm:$0xff] }
   0x5   :  { %v71_v8 = vld [vmem:[%s831_s1 + $0x1a0] sm:$0xff]  ;;  %168 = vmatpush.msra.mxu1 %v139_v5  ;;  %v72_v10 = vld [vmem:[%s831_s1 + $0x1a8] sm:$0xff]  ;;  %208 = vmatpush.msra.mxu3 %v140_v7  ;;  %v146_v3 = vld [vmem:[%s831_s1 + $0x3f8] sm:$0xff] }
   0x6   :  { %v135_v9 = vld [vmem:[%s831_s1 + $0x3a0] sm:$0xff]  ;;  %v136_v11 = vld [vmem:[%s831_s1 + $0x3a8] sm:$0xff]  ;;  %149 = vmatpush.msra.mxu0 %v71_v8  ;;  %189 = vmatpush.msra.mxu2 %v72_v10  ;;  %v77_v4 = vld [vmem:[%s831_s1 + $0x1d0] sm:$0xff] }
   0x7   :  { %v67_v12 = vld [vmem:[%s831_s1 + $0x180] sm:$0xff]  ;;  %169 = vmatpush.msra.mxu1 %v135_v9  ;;  %v68_v14 = vld [vmem:[%s831_s1 + $0x188] sm:$0xff]  ;;  %209 = vmatpush.msra.mxu3 %v136_v11  ;;  %v141_v5 = vld [vmem:[%s831_s1 + $0x3d0] sm:$0xff] }
   0x8   :  { %v131_v13 = vld [vmem:[%s831_s1 + $0x380] sm:$0xff]  ;;  %v132_v15 = vld [vmem:[%s831_s1 + $0x388] sm:$0xff]  ;;  %150 = vmatpush.msra.mxu0 %v67_v12  ;;  %190 = vmatpush.msra.mxu2 %v68_v14  ;;  %v78_v6 = vld [vmem:[%s831_s1 + $0x1d8] sm:$0xff] }
   0x9   :  { %v63_v16 = vld [vmem:[%s831_s1 + $0x160] sm:$0xff]  ;;  %170 = vmatpush.msra.mxu1 %v131_v13  ;;  %v64_v18 = vld [vmem:[%s831_s1 + $0x168] sm:$0xff]  ;;  %210 = vmatpush.msra.mxu3 %v132_v15  ;;  %v142_v7 = vld [vmem:[%s831_s1 + $0x3d8] sm:$0xff] }
   0xa   :  { %v127_v17 = vld [vmem:[%s831_s1 + $0x360] sm:$0xff]  ;;  %v128_v19 = vld [vmem:[%s831_s1 + $0x368] sm:$0xff]  ;;  %151 = vmatpush.msra.mxu0 %v63_v16  ;;  %191 = vmatpush.msra.mxu2 %v64_v18  ;;  %v73_v8 = vld [vmem:[%s831_s1 + $0x1b0] sm:$0xff] }
   0xb   :  { %v59_v20 = vld [vmem:[%s831_s1 + $0x140] sm:$0xff]  ;;  %171 = vmatpush.msra.mxu1 %v127_v17  ;;  %v60_v22 = vld [vmem:[%s831_s1 + $0x148] sm:$0xff]  ;;  %211 = vmatpush.msra.mxu3 %v128_v19  ;;  %v137_v9 = vld [vmem:[%s831_s1 + $0x3b0] sm:$0xff] }
   0xc   :  { %v123_v21 = vld [vmem:[%s831_s1 + $0x340] sm:$0xff]  ;;  %v124_v23 = vld [vmem:[%s831_s1 + $0x348] sm:$0xff]  ;;  %152 = vmatpush.msra.mxu0 %v59_v20  ;;  %192 = vmatpush.msra.mxu2 %v60_v22  ;;  %v74_v10 = vld [vmem:[%s831_s1 + $0x1b8] sm:$0xff] }
   0xd   :  { %v55_v24 = vld [vmem:[%s831_s1 + $0x120] sm:$0xff]  ;;  %172 = vmatpush.msra.mxu1 %v123_v21  ;;  %v56_v26 = vld [vmem:[%s831_s1 + $0x128] sm:$0xff]  ;;  %212 = vmatpush.msra.mxu3 %v124_v23  ;;  %v138_v11 = vld [vmem:[%s831_s1 + $0x3b8] sm:$0xff] }
   0xe   :  { %v119_v25 = vld [vmem:[%s831_s1 + $0x320] sm:$0xff]  ;;  %v120_v27 = vld [vmem:[%s831_s1 + $0x328] sm:$0xff]  ;;  %153 = vmatpush.msra.mxu0 %v55_v24  ;;  %193 = vmatpush.msra.mxu2 %v56_v26  ;;  %v69_v12 = vld [vmem:[%s831_s1 + $0x190] sm:$0xff] }
   0xf   :  { %v51_v28 = vld [vmem:[%s831_s1 + $0x100] sm:$0xff]  ;;  %173 = vmatpush.msra.mxu1 %v119_v25  ;;  %v52_v30 = vld [vmem:[%s831_s1 + $0x108] sm:$0xff]  ;;  %213 = vmatpush.msra.mxu3 %v120_v27  ;;  %v133_v13 = vld [vmem:[%s831_s1 + $0x390] sm:$0xff] }
  0x10   :  { %v115_v29 = vld [vmem:[%s831_s1 + $0x300] sm:$0xff]  ;;  %v116_v31 = vld [vmem:[%s831_s1 + $0x308] sm:$0xff]  ;;  %154 = vmatpush.msra.mxu0 %v51_v28  ;;  %194 = vmatpush.msra.mxu2 %v52_v30  ;;  %v70_v14 = vld [vmem:[%s831_s1 + $0x198] sm:$0xff] }
  0x11   :  { %v47_v32 = vld [vmem:[%s831_s1 + $0xe0] sm:$0xff]  ;;  %174 = vmatpush.msra.mxu1 %v115_v29  ;;  %v48_v34 = vld [vmem:[%s831_s1 + $0xe8] sm:$0xff]  ;;  %214 = vmatpush.msra.mxu3 %v116_v31  ;;  %v134_v15 = vld [vmem:[%s831_s1 + $0x398] sm:$0xff] }
  0x12   :  { %v111_v33 = vld [vmem:[%s831_s1 + $0x2e0] sm:$0xff]  ;;  %v112_v35 = vld [vmem:[%s831_s1 + $0x2e8] sm:$0xff]  ;;  %155 = vmatpush.msra.mxu0 %v47_v32  ;;  %195 = vmatpush.msra.mxu2 %v48_v34  ;;  %v65_v16 = vld [vmem:[%s831_s1 + $0x170] sm:$0xff] }
  0x13   :  { %v43_v36 = vld [vmem:[%s831_s1 + $0xc0] sm:$0xff]  ;;  %175 = vmatpush.msra.mxu1 %v111_v33  ;;  %v44_v38 = vld [vmem:[%s831_s1 + $0xc8] sm:$0xff]  ;;  %215 = vmatpush.msra.mxu3 %v112_v35  ;;  %v129_v17 = vld [vmem:[%s831_s1 + $0x370] sm:$0xff] }
  0x14   :  { %v107_v37 = vld [vmem:[%s831_s1 + $0x2c0] sm:$0xff]  ;;  %v108_v39 = vld [vmem:[%s831_s1 + $0x2c8] sm:$0xff]  ;;  %156 = vmatpush.msra.mxu0 %v43_v36  ;;  %196 = vmatpush.msra.mxu2 %v44_v38  ;;  %v66_v18 = vld [vmem:[%s831_s1 + $0x178] sm:$0xff] }
  0x15   :  { %v39_v40 = vld [vmem:[%s831_s1 + $0xa0] sm:$0xff]  ;;  %176 = vmatpush.msra.mxu1 %v107_v37  ;;  %v40_v42 = vld [vmem:[%s831_s1 + $0xa8] sm:$0xff]  ;;  %216 = vmatpush.msra.mxu3 %v108_v39  ;;  %v130_v19 = vld [vmem:[%s831_s1 + $0x378] sm:$0xff] }
  0x16   :  { %v103_v41 = vld [vmem:[%s831_s1 + $0x2a0] sm:$0xff]  ;;  %v104_v43 = vld [vmem:[%s831_s1 + $0x2a8] sm:$0xff]  ;;  %157 = vmatpush.msra.mxu0 %v39_v40  ;;  %197 = vmatpush.msra.mxu2 %v40_v42  ;;  %v61_v20 = vld [vmem:[%s831_s1 + $0x150] sm:$0xff] }
  0x17   :  { %v35_v44 = vld [vmem:[%s831_s1 + $0x80] sm:$0xff]  ;;  %177 = vmatpush.msra.mxu1 %v103_v41  ;;  %v36_v46 = vld [vmem:[%s831_s1 + $0x88] sm:$0xff]  ;;  %217 = vmatpush.msra.mxu3 %v104_v43  ;;  %v125_v21 = vld [vmem:[%s831_s1 + $0x350] sm:$0xff] }
  0x18   :  { %v99_v45 = vld [vmem:[%s831_s1 + $0x280] sm:$0xff]  ;;  %v100_v47 = vld [vmem:[%s831_s1 + $0x288] sm:$0xff]  ;;  %158 = vmatpush.msra.mxu0 %v35_v44  ;;  %198 = vmatpush.msra.mxu2 %v36_v46  ;;  %v62_v22 = vld [vmem:[%s831_s1 + $0x158] sm:$0xff] }
  0x19   :  { %v31_v48 = vld [vmem:[%s831_s1 + $0x60] sm:$0xff]  ;;  %178 = vmatpush.msra.mxu1 %v99_v45  ;;  %v32_v50 = vld [vmem:[%s831_s1 + $0x68] sm:$0xff]  ;;  %218 = vmatpush.msra.mxu3 %v100_v47  ;;  %v126_v23 = vld [vmem:[%s831_s1 + $0x358] sm:$0xff] }
  0x1a   :  { %v95_v49 = vld [vmem:[%s831_s1 + $0x260] sm:$0xff]  ;;  %v96_v51 = vld [vmem:[%s831_s1 + $0x268] sm:$0xff]  ;;  %159 = vmatpush.msra.mxu0 %v31_v48  ;;  %199 = vmatpush.msra.mxu2 %v32_v50  ;;  %v57_v24 = vld [vmem:[%s831_s1 + $0x130] sm:$0xff] }
  0x1b   :  { %v27_v52 = vld [vmem:[%s831_s1 + $0x40] sm:$0xff]  ;;  %179 = vmatpush.msra.mxu1 %v95_v49  ;;  %v28_v54 = vld [vmem:[%s831_s1 + $0x48] sm:$0xff]  ;;  %219 = vmatpush.msra.mxu3 %v96_v51  ;;  %v121_v25 = vld [vmem:[%s831_s1 + $0x330] sm:$0xff] }
  0x1c   :  { %v91_v53 = vld [vmem:[%s831_s1 + $0x240] sm:$0xff]  ;;  %v92_v55 = vld [vmem:[%s831_s1 + $0x248] sm:$0xff]  ;;  %160 = vmatpush.msra.mxu0 %v27_v52  ;;  %200 = vmatpush.msra.mxu2 %v28_v54  ;;  %v58_v26 = vld [vmem:[%s831_s1 + $0x138] sm:$0xff] }
  0x1d   :  { %v23_v56 = vld [vmem:[%s831_s1 + $0x20] sm:$0xff]  ;;  %180 = vmatpush.msra.mxu1 %v91_v53  ;;  %v24_v58 = vld [vmem:[%s831_s1 + $0x28] sm:$0xff]  ;;  %220 = vmatpush.msra.mxu3 %v92_v55  ;;  %v122_v27 = vld [vmem:[%s831_s1 + $0x338] sm:$0xff] }
  0x1e   :  { %v87_v57 = vld [vmem:[%s831_s1 + $0x220] sm:$0xff]  ;;  %v88_v59 = vld [vmem:[%s831_s1 + $0x228] sm:$0xff]  ;;  %161 = vmatpush.msra.mxu0 %v23_v56  ;;  %201 = vmatpush.msra.mxu2 %v24_v58  ;;  %v53_v28 = vld [vmem:[%s831_s1 + $0x110] sm:$0xff] }
  0x1f   :  { %v19_v60 = vld [vmem:[%s831_s1] sm:$0xff]  ;;  %181 = vmatpush.msra.mxu1 %v87_v57  ;;  %v20_v62 = vld [vmem:[%s831_s1 + $0x8] sm:$0xff]  ;;  %221 = vmatpush.msra.mxu3 %v88_v59  ;;  %v117_v29 = vld [vmem:[%s831_s1 + $0x310] sm:$0xff] }
  0x20   :  { %v83_v61 = vld [vmem:[%s831_s1 + $0x200] sm:$0xff]  ;;  %v84_v63 = vld [vmem:[%s831_s1 + $0x208] sm:$0xff]  ;;  %162 = vmatpush.msra.mxu0 %v19_v60  ;;  %202 = vmatpush.msra.mxu2 %v20_v62  ;;  %v54_v30 = vld [vmem:[%s831_s1 + $0x118] sm:$0xff] }
  0x21   :  { %182 = vmatpush.msra.mxu1 %v83_v61  ;;  %222 = vmatpush.msra.mxu3 %v84_v63  ;;  %v118_v31 = vld [vmem:[%s831_s1 + $0x318] sm:$0xff]  ;;  %v49_v32 = vld [vmem:[%s831_s1 + $0xf0] sm:$0xff]  ;;  %v17_v44 = vld [vmem:[%s832_s0] sm:$0xff] }
  0x22   :  { %227 = vmatpush.msrb.mxu0 %v81_v0  ;;  %267 = vmatpush.msrb.mxu2 %v82_v2  ;;  %v113_v33 = vld [vmem:[%s831_s1 + $0x2f0] sm:$0xff]  ;;  %v50_v34 = vld [vmem:[%s831_s1 + $0xf8] sm:$0xff]  ;;  %v18_v45 = vld [vmem:[%s832_s0 + $0x8] sm:$0xff] }
  0x23   :  { %247 = vmatpush.msrb.mxu1 %v145_v1  ;;  %287 = vmatpush.msrb.mxu3 %v146_v3  ;;  %v114_v35 = vld [vmem:[%s831_s1 + $0x2f8] sm:$0xff]  ;;  %v45_v36 = vld [vmem:[%s831_s1 + $0xd0] sm:$0xff] }
  0x24   :  { %228 = vmatpush.msrb.mxu0 %v77_v4  ;;  %268 = vmatpush.msrb.mxu2 %v78_v6  ;;  %v109_v37 = vld [vmem:[%s831_s1 + $0x2d0] sm:$0xff]  ;;  %v46_v38 = vld [vmem:[%s831_s1 + $0xd8] sm:$0xff] }
  0x25   :  { %248 = vmatpush.msrb.mxu1 %v141_v5  ;;  %288 = vmatpush.msrb.mxu3 %v142_v7  ;;  %v110_v39 = vld [vmem:[%s831_s1 + $0x2d8] sm:$0xff]  ;;  %v41_v40 = vld [vmem:[%s831_s1 + $0xb0] sm:$0xff] }
  0x26   :  { %229 = vmatpush.msrb.mxu0 %v73_v8  ;;  %269 = vmatpush.msrb.mxu2 %v74_v10  ;;  %v105_v41 = vld [vmem:[%s831_s1 + $0x2b0] sm:$0xff]  ;;  %v42_v42 = vld [vmem:[%s831_s1 + $0xb8] sm:$0xff] }
  0x27   :  { %249 = vmatpush.msrb.mxu1 %v137_v9  ;;  %289 = vmatpush.msrb.mxu3 %v138_v11  ;;  %v106_v43 = vld [vmem:[%s831_s1 + $0x2b8] sm:$0xff]  ;;  %v37_v46 = vld [vmem:[%s831_s1 + $0x90] sm:$0xff] }
  0x28   :  { %230 = vmatpush.msrb.mxu0 %v69_v12  ;;  %270 = vmatpush.msrb.mxu2 %v70_v14  ;;  %v101_v47 = vld [vmem:[%s831_s1 + $0x290] sm:$0xff]  ;;  %v38_v48 = vld [vmem:[%s831_s1 + $0x98] sm:$0xff] }
  0x29   :  { %250 = vmatpush.msrb.mxu1 %v133_v13  ;;  %290 = vmatpush.msrb.mxu3 %v134_v15  ;;  %v102_v49 = vld [vmem:[%s831_s1 + $0x298] sm:$0xff]  ;;  %v33_v50 = vld [vmem:[%s831_s1 + $0x70] sm:$0xff] }
  0x2a   :  { %231 = vmatpush.msrb.mxu0 %v65_v16  ;;  %271 = vmatpush.msrb.mxu2 %v66_v18  ;;  %v97_v51 = vld [vmem:[%s831_s1 + $0x270] sm:$0xff]  ;;  %v34_v52 = vld [vmem:[%s831_s1 + $0x78] sm:$0xff] }
  0x2b   :  { %251 = vmatpush.msrb.mxu1 %v129_v17  ;;  %291 = vmatpush.msrb.mxu3 %v130_v19  ;;  %v98_v53 = vld [vmem:[%s831_s1 + $0x278] sm:$0xff]  ;;  %v29_v54 = vld [vmem:[%s831_s1 + $0x50] sm:$0xff]  ;;  %v396_v17 = vmov 512.0  }
  0x2c   :  { %232 = vmatpush.msrb.mxu0 %v61_v20  ;;  %272 = vmatpush.msrb.mxu2 %v62_v22  ;;  %v93_v55 = vld [vmem:[%s831_s1 + $0x250] sm:$0xff]  ;;  %v30_v56 = vld [vmem:[%s831_s1 + $0x58] sm:$0xff]  ;;  %392 = vrcp.f32 %v396_v17 }
  0x2d   :  { %252 = vmatpush.msrb.mxu1 %v125_v21  ;;  %292 = vmatpush.msrb.mxu3 %v126_v23  ;;  %v94_v57 = vld [vmem:[%s831_s1 + $0x258] sm:$0xff]  ;;  %v25_v58 = vld [vmem:[%s831_s1 + $0x30] sm:$0xff] }
  0x2e   :  { %233 = vmatpush.msrb.mxu0 %v57_v24  ;;  %273 = vmatpush.msrb.mxu2 %v58_v26  ;;  %v89_v59 = vld [vmem:[%s831_s1 + $0x230] sm:$0xff]  ;;  %v26_v60 = vld [vmem:[%s831_s1 + $0x38] sm:$0xff] }
  0x2f   :  { %253 = vmatpush.msrb.mxu1 %v121_v25  ;;  %293 = vmatpush.msrb.mxu3 %v122_v27  ;;  %v90_v61 = vld [vmem:[%s831_s1 + $0x238] sm:$0xff]  ;;  %v21_v62 = vld [vmem:[%s831_s1 + $0x10] sm:$0xff] }
  0x30   :  { %234 = vmatpush.msrb.mxu0 %v53_v28  ;;  %274 = vmatpush.msrb.mxu2 %v54_v30  ;;  %v85_v63 = vld [vmem:[%s831_s1 + $0x210] sm:$0xff]  ;;  %v22_v0 = vld [vmem:[%s831_s1 + $0x18] sm:$0xff] }
  0x31   :  { %254 = vmatpush.msrb.mxu1 %v117_v29  ;;  %294 = vmatpush.msrb.mxu3 %v118_v31  ;;  %v86_v1 = vld [vmem:[%s831_s1 + $0x218] sm:$0xff] }
  0x32   :  { %235 = vmatpush.msrb.mxu0 %v49_v32  ;;  %275 = vmatpush.msrb.mxu2 %v50_v34  ;;  %v393_v18 = vpop.eup %392 }
  0x33   :  { %255 = vmatpush.msrb.mxu1 %v113_v33  ;;  %295 = vmatpush.msrb.mxu3 %v114_v35  ;;  %v313_v19 = vmul.f32 512.0, %v393_v18  ;;  %vm317_vm0 = vweird.f32 %v393_v18 }
  0x34   :  { %236 = vmatpush.msrb.mxu0 %v45_v36  ;;  %276 = vmatpush.msrb.mxu2 %v46_v38 }
  0x35   :  { %256 = vmatpush.msrb.mxu1 %v109_v37  ;;  %296 = vmatpush.msrb.mxu3 %v110_v39  ;;  %v314_v20 = vsub.f32 1.0, %v313_v19  ;;  %v397_v37 = vmov 0  }
  0x36   :  { %237 = vmatpush.msrb.mxu0 %v41_v40  ;;  %277 = vmatpush.msrb.mxu2 %v42_v42 }
  0x37   :  { %257 = vmatpush.msrb.mxu1 %v105_v41  ;;  %297 = vmatpush.msrb.mxu3 %v106_v43  ;;  %v315_v21 = vmul.f32 %v393_v18, %v314_v20 }
  0x38   :  { %203 = vmatmul.f32.vlgmr.msra.gmra.mxu2 %v17_v44  ;;  %223 = vmatmul.f32.vlgmr.msra.gmra.mxu3 %v18_v45 }
  0x39   :  { %238 = vmatpush.msrb.mxu0 %v37_v46  ;;  %258 = vmatpush.msrb.mxu1 %v101_v47  ;;  %v316_v22 = vadd.f32 %v393_v18, %v315_v21  ;;  %v334_v46 = vld [vmem:[%s833_s2] sm:$0xff] }
  0x3a   :  { %278 = vmatpush.msrb.mxu2 %v38_v48  ;;  %298 = vmatpush.msrb.mxu3 %v102_v49 }
  0x3b   :  { %163 = vmatmul.f32.vlgmr.msra.gmra.mxu0 %v17_v44  ;;  %183 = vmatmul.f32.vlgmr.msra.gmra.mxu1 %v18_v45  ;;  %v318_v23 = vsel %vm317_vm0, %v393_v18, %v316_v22 }
  0x3c   :  { %239 = vmatpush.msrb.mxu0 %v33_v50  ;;  %259 = vmatpush.msrb.mxu1 %v97_v51  ;;  %v347_v51 = vld [vmem:[%s834_s3] sm:$0xff] }
  0x3d   :  { %279 = vmatpush.msrb.mxu2 %v34_v52  ;;  %299 = vmatpush.msrb.mxu3 %v98_v53 }
  0x3e   :  { %240 = vmatpush.msrb.mxu0 %v29_v54  ;;  %260 = vmatpush.msrb.mxu1 %v93_v55 }
  0x3f   :  { %280 = vmatpush.msrb.mxu2 %v30_v56  ;;  %300 = vmatpush.msrb.mxu3 %v94_v57 }
  0x40   :  { %241 = vmatpush.msrb.mxu0 %v25_v58  ;;  %261 = vmatpush.msrb.mxu1 %v89_v59 }
  0x41   :  { %281 = vmatpush.msrb.mxu2 %v26_v60  ;;  %301 = vmatpush.msrb.mxu3 %v90_v61 }
  0x42   :  { %242 = vmatpush.msrb.mxu0 %v21_v62  ;;  %262 = vmatpush.msrb.mxu1 %v85_v63 }
  0x43   :  { %282 = vmatpush.msrb.mxu2 %v22_v0  ;;  %302 = vmatpush.msrb.mxu3 %v86_v1 }
  0x44   :  { %243 = vmatmul.f32.vlgmr.msrb.gmra.mxu0 %v17_v44  ;;  %263 = vmatmul.f32.vlgmr.msrb.gmra.mxu1 %v18_v45 }
  0x45   :  { %283 = vmatmul.f32.vlgmr.msrb.gmra.mxu2 %v17_v44  ;;  %303 = vmatmul.f32.vlgmr.msrb.gmra.mxu3 %v18_v45 }
  0x46   :  { %390 = vset.pattern.permute.xlu1 %v397_v37  ;;  %391 = vset.pattern.permute.xlu0 %v397_v37 }
  0xb8   :  { %v164_v2 = vpop.f32.mrf.mxu0  ;;  %v184_v3 = vpop.f32.mrf.mxu1 }
  0xb9   :  { %v185_v8 = vadd.f32 %v184_v3, %v164_v2 }
  0xbb   :  { %v204_v4 = vpop.f32.mrf.mxu2  ;;  %v224_v5 = vpop.f32.mrf.mxu3 }
  0xbc   :  { %v225_v9 = vadd.f32 %v224_v5, %v204_v4 }
  0xbe   :  { %v307_v11 = vadd.f32 %v225_v9, %v185_v8 }
  0xc1   :  { %v244_v6 = vpop.f32.mrf.mxu0  ;;  %v264_v7 = vpop.f32.mrf.mxu1 }
  0xc2   :  { %v265_v10 = vadd.f32 %v264_v7, %v244_v6 }
  0xc4   :  { %v308_v15 = vadd.f32 %v307_v11, %v265_v10 }
  0xc8   :  { %v284_v12 = vpop.f32.mrf.mxu2  ;;  %v304_v13 = vpop.f32.mrf.mxu3 }
  0xc9   :  { %v305_v14 = vadd.f32 %v304_v13, %v284_v12 }
  0xcb   :  { %v309_v16 = vadd.f32 %v308_v15, %v305_v14 }
  0xcd   :  { %310 = vadd.xlane.f32.xlu0 %v309_v16 }
 0x140   :  { %v311_v24 = vpop.xlane.xlu0 %310 }
 0x141   :  { %v319_v25 = vmul.f32 %v318_v23, %v311_v24 }
 0x143   :  { %v320_v26 = vsub.f32 %v185_v8, %v319_v25  ;;  %v321_v27 = vsub.f32 %v225_v9, %v319_v25  ;;  %v322_v28 = vsub.f32 %v265_v10, %v319_v25  ;;  %v323_v29 = vsub.f32 %v305_v14, %v319_v25 }
 0x145   :  { %v324_v30 = vmul.f32 %v320_v26, %v320_v26  ;;  %v325_v31 = vmul.f32 %v321_v27, %v321_v27  ;;  %v326_v32 = vmul.f32 %v322_v28, %v322_v28  ;;  %v327_v34 = vmul.f32 %v323_v29, %v323_v29 }
 0x147   :  { %v328_v33 = vadd.f32 %v325_v31, %v324_v30 }
 0x149   :  { %v329_v35 = vadd.f32 %v328_v33, %v326_v32 }
 0x14b   :  { %v330_v36 = vadd.f32 %v329_v35, %v327_v34 }
 0x14d   :  { %331 = vadd.xlane.f32.xlu0 %v330_v36 }
 0x1c0   :  { %v332_v38 = vpop.xlane.xlu0 %331 }
 0x1c1   :  { %v333_v39 = vmul.f32 %v332_v38, %v318_v23 }
 0x1c3   :  { %v335_v40 = vadd.f32 1e-05, %v333_v39 }
 0x1c5   :  { %394 = vrsqrt.f32 %v335_v40  ;;  %vm342_vm2 = vweird.f32 %v335_v40 }
 0x1cb   :  { %v395_v41 = vpop.eup %394 }
 0x1cc   :  { %v337_v42 = vmul.f32 %v395_v41, %v335_v40  ;;  %vm343_vm1 = vweird.f32 %v395_v41 }
 0x1cd   :  { %vm344_vm3 = vmor %vm342_vm2, %vm343_vm1 }
 0x1ce   :  { %v338_v43 = vmul.f32 %v395_v41, %v337_v42 }
 0x1d0   :  { %v339_v44 = vmul.f32 0.5, %v338_v43 }
 0x1d2   :  { %v340_v45 = vsub.f32 1.5, %v339_v44 }
 0x1d4   :  { %v341_v47 = vmul.f32 %v395_v41, %v340_v45 }
 0x1d6   :  { %v345_v48 = vsel %vm344_vm3, %v395_v41, %v341_v47 }
 0x1d7   :  { %v346_v49 = vmul.f32 %v345_v48, %v334_v46 }
 0x1d9   :  { %352 = vperm.xlu1 %390, %v346_v49   ;;  %v348_v50 = vmul.f32 %v346_v49, %v319_v25 }
 0x1db   :  { %v349_v52 = vsub.f32 %v347_v51, %v348_v50 }
 0x1e1   :  { %361 = vperm.xlu1 %390, %v349_v52  }
 0x24b   :  { %v353_v53 = vpop.permute.xlu1 %352 }
 0x24c   :  { %v355_v54 = vmul.f32 %v353_v53, %v185_v8  ;;  %v356_v55 = vmul.f32 %v353_v53, %v225_v9  ;;  %v357_v56 = vmul.f32 %v353_v53, %v265_v10  ;;  %v358_v57 = vmul.f32 %v353_v53, %v305_v14 }
 0x253   :  { %v362_v58 = vpop.permute.xlu1 %361 }
 0x254   :  { %v364_v59 = vadd.f32 %v362_v58, %v355_v54  ;;  %v365_v60 = vadd.f32 %v362_v58, %v356_v55  ;;  %v366_v61 = vadd.f32 %v362_v58, %v357_v56  ;;  %v367_v62 = vadd.f32 %v362_v58, %v358_v57 }
 0x256   :  { %vm368_vm4 = vcmp.ge.f32.partialorder %v364_v59, 0.0  ;;  %vm369_vm5 = vcmp.ge.f32.partialorder %v365_v60, 0.0  ;;  %vm370_vm6 = vcmp.ge.f32.partialorder %v366_v61, 0.0  ;;  %vm371_vm7 = vcmp.ge.f32.partialorder %v367_v62, 0.0 }
 0x257   :  { %v372_v63 = vmul.f32 0.05, %v364_v59  ;;  %v373_v0 = vmul.f32 0.05, %v365_v60  ;;  %v374_v1 = vmul.f32 0.05, %v366_v61 }
 0x258   :  { %v375_v2 = vmul.f32 0.05, %v367_v62 }
 0x259   :  { %v376_v3 = vsel %vm368_vm4, %v364_v59, %v372_v63  ;;  %v377_v4 = vsel %vm369_vm5, %v365_v60, %v373_v0  ;;  %v378_v5 = vsel %vm370_vm6, %v366_v61, %v374_v1 }
 0x25a   :  { %v379_v6 = vsel %vm371_vm7, %v367_v62, %v375_v2  ;;  %380 = vst [vmem:[%s835_s4] sm:$0xff] %v376_v3 }
 0x25b   :  { %381 = vst [vmem:[%s835_s4 + $0x8] sm:$0xff] %v377_v4 }
 0x25c   :  { %382 = vst [vmem:[%s835_s4 + $0x10] sm:$0xff] %v378_v5 }
 0x25d   :  { %383 = vst [vmem:[%s835_s4 + $0x18] sm:$0xff] %v379_v6 }

// kernel: g12_forward.11
= control target key start
LH: loop header
LB: loop body
LE: loop exit
PB: predicated region body
PF: predicated region fallthrough
CT: control target
= control target key end

     0   :  { %vm628_vm0 = vcmask 1043456   ;;  %s1525_s1 = inlined_call_operand.vmem [shape: f32[128,2048], index: 1, kind: input, shape index: {}]   ;;  %s1526_s0 = inlined_call_operand.vmem [shape: f32[3,128], index: 0, kind: input, shape index: {}]   ;;  %s1527_s2 = inlined_call_operand.vmem [shape: f32[3,2048], index: 2, kind: output, shape index: {}]  }
   0x1   :  { %v255_v0 = vld [vmem:[%s1525_s1 + $0x798] sm:$0xff]  ;;  %v254_v1 = vld [vmem:[%s1525_s1 + $0x790] sm:$0xff]  ;;  %v253_v4 = vld [vmem:[%s1525_s1 + $0x788] sm:$0xff] }
   0x2   :  { %v239_v2 = vld [vmem:[%s1525_s1 + $0x718] sm:$0xff]  ;;  %328 = vmatpush.msra.mxu3 %v255_v0  ;;  %308 = vmatpush.msra.mxu2 %v254_v1  ;;  %v238_v3 = vld [vmem:[%s1525_s1 + $0x710] sm:$0xff]  ;;  %v252_v7 = vld [vmem:[%s1525_s1 + $0x780] sm:$0xff] }
   0x3   :  { %v223_v5 = vld [vmem:[%s1525_s1 + $0x698] sm:$0xff]  ;;  %288 = vmatpush.msra.mxu1 %v253_v4  ;;  %v222_v6 = vld [vmem:[%s1525_s1 + $0x690] sm:$0xff]  ;;  %v237_v9 = vld [vmem:[%s1525_s1 + $0x708] sm:$0xff]  ;;  %268 = vmatpush.msra.mxu0 %v252_v7 }
   0x4   :  { %329 = vmatpush.msra.mxu3 %v239_v2  ;;  %309 = vmatpush.msra.mxu2 %v238_v3  ;;  %v207_v8 = vld [vmem:[%s1525_s1 + $0x618] sm:$0xff]  ;;  %v206_v10 = vld [vmem:[%s1525_s1 + $0x610] sm:$0xff]  ;;  %v236_v11 = vld [vmem:[%s1525_s1 + $0x700] sm:$0xff] }
   0x5   :  { %289 = vmatpush.msra.mxu1 %v237_v9  ;;  %v221_v12 = vld [vmem:[%s1525_s1 + $0x688] sm:$0xff]  ;;  %v220_v13 = vld [vmem:[%s1525_s1 + $0x680] sm:$0xff]  ;;  %v191_v15 = vld [vmem:[%s1525_s1 + $0x598] sm:$0xff]  ;;  %269 = vmatpush.msra.mxu0 %v236_v11 }
   0x6   :  { %330 = vmatpush.msra.mxu3 %v223_v5  ;;  %310 = vmatpush.msra.mxu2 %v222_v6  ;;  %v205_v14 = vld [vmem:[%s1525_s1 + $0x608] sm:$0xff]  ;;  %v190_v16 = vld [vmem:[%s1525_s1 + $0x590] sm:$0xff]  ;;  %v204_v17 = vld [vmem:[%s1525_s1 + $0x600] sm:$0xff] }
   0x7   :  { %290 = vmatpush.msra.mxu1 %v221_v12  ;;  %v189_v18 = vld [vmem:[%s1525_s1 + $0x588] sm:$0xff]  ;;  %v175_v19 = vld [vmem:[%s1525_s1 + $0x518] sm:$0xff]  ;;  %270 = vmatpush.msra.mxu0 %v220_v13  ;;  %v174_v20 = vld [vmem:[%s1525_s1 + $0x510] sm:$0xff] }
   0x8   :  { %331 = vmatpush.msra.mxu3 %v207_v8  ;;  %311 = vmatpush.msra.mxu2 %v206_v10  ;;  %v188_v21 = vld [vmem:[%s1525_s1 + $0x580] sm:$0xff]  ;;  %v173_v22 = vld [vmem:[%s1525_s1 + $0x508] sm:$0xff]  ;;  %v159_v23 = vld [vmem:[%s1525_s1 + $0x498] sm:$0xff] }
   0x9   :  { %291 = vmatpush.msra.mxu1 %v205_v14  ;;  %271 = vmatpush.msra.mxu0 %v204_v17  ;;  %v158_v24 = vld [vmem:[%s1525_s1 + $0x490] sm:$0xff]  ;;  %v172_v25 = vld [vmem:[%s1525_s1 + $0x500] sm:$0xff]  ;;  %v157_v26 = vld [vmem:[%s1525_s1 + $0x488] sm:$0xff] }
   0xa   :  { %332 = vmatpush.msra.mxu3 %v191_v15  ;;  %312 = vmatpush.msra.mxu2 %v190_v16  ;;  %v143_v27 = vld [vmem:[%s1525_s1 + $0x418] sm:$0xff]  ;;  %v142_v28 = vld [vmem:[%s1525_s1 + $0x410] sm:$0xff]  ;;  %v156_v29 = vld [vmem:[%s1525_s1 + $0x480] sm:$0xff] }
   0xb   :  { %292 = vmatpush.msra.mxu1 %v189_v18  ;;  %272 = vmatpush.msra.mxu0 %v188_v21  ;;  %v141_v30 = vld [vmem:[%s1525_s1 + $0x408] sm:$0xff]  ;;  %v127_v31 = vld [vmem:[%s1525_s1 + $0x398] sm:$0xff]  ;;  %v126_v32 = vld [vmem:[%s1525_s1 + $0x390] sm:$0xff] }
   0xc   :  { %333 = vmatpush.msra.mxu3 %v175_v19  ;;  %313 = vmatpush.msra.mxu2 %v174_v20  ;;  %v140_v33 = vld [vmem:[%s1525_s1 + $0x400] sm:$0xff]  ;;  %v125_v34 = vld [vmem:[%s1525_s1 + $0x388] sm:$0xff]  ;;  %v111_v35 = vld [vmem:[%s1525_s1 + $0x318] sm:$0xff] }
   0xd   :  { %293 = vmatpush.msra.mxu1 %v173_v22  ;;  %273 = vmatpush.msra.mxu0 %v172_v25  ;;  %v110_v36 = vld [vmem:[%s1525_s1 + $0x310] sm:$0xff]  ;;  %v124_v37 = vld [vmem:[%s1525_s1 + $0x380] sm:$0xff]  ;;  %v109_v38 = vld [vmem:[%s1525_s1 + $0x308] sm:$0xff] }
   0xe   :  { %334 = vmatpush.msra.mxu3 %v159_v23  ;;  %314 = vmatpush.msra.mxu2 %v158_v24  ;;  %v95_v39 = vld [vmem:[%s1525_s1 + $0x298] sm:$0xff]  ;;  %v94_v40 = vld [vmem:[%s1525_s1 + $0x290] sm:$0xff]  ;;  %v108_v41 = vld [vmem:[%s1525_s1 + $0x300] sm:$0xff] }
   0xf   :  { %294 = vmatpush.msra.mxu1 %v157_v26  ;;  %274 = vmatpush.msra.mxu0 %v156_v29  ;;  %v93_v42 = vld [vmem:[%s1525_s1 + $0x288] sm:$0xff]  ;;  %v79_v43 = vld [vmem:[%s1525_s1 + $0x218] sm:$0xff]  ;;  %v78_v44 = vld [vmem:[%s1525_s1 + $0x210] sm:$0xff] }
  0x10   :  { %335 = vmatpush.msra.mxu3 %v143_v27  ;;  %315 = vmatpush.msra.mxu2 %v142_v28  ;;  %v92_v45 = vld [vmem:[%s1525_s1 + $0x280] sm:$0xff]  ;;  %v77_v46 = vld [vmem:[%s1525_s1 + $0x208] sm:$0xff]  ;;  %v63_v47 = vld [vmem:[%s1525_s1 + $0x198] sm:$0xff] }
  0x11   :  { %295 = vmatpush.msra.mxu1 %v141_v30  ;;  %275 = vmatpush.msra.mxu0 %v140_v33  ;;  %v62_v48 = vld [vmem:[%s1525_s1 + $0x190] sm:$0xff]  ;;  %v76_v49 = vld [vmem:[%s1525_s1 + $0x200] sm:$0xff]  ;;  %v61_v50 = vld [vmem:[%s1525_s1 + $0x188] sm:$0xff] }
  0x12   :  { %336 = vmatpush.msra.mxu3 %v127_v31  ;;  %316 = vmatpush.msra.mxu2 %v126_v32  ;;  %v47_v51 = vld [vmem:[%s1525_s1 + $0x118] sm:$0xff]  ;;  %v46_v52 = vld [vmem:[%s1525_s1 + $0x110] sm:$0xff]  ;;  %v60_v53 = vld [vmem:[%s1525_s1 + $0x180] sm:$0xff] }
  0x13   :  { %296 = vmatpush.msra.mxu1 %v125_v34  ;;  %276 = vmatpush.msra.mxu0 %v124_v37  ;;  %v45_v54 = vld [vmem:[%s1525_s1 + $0x108] sm:$0xff]  ;;  %v31_v55 = vld [vmem:[%s1525_s1 + $0x98] sm:$0xff]  ;;  %v30_v56 = vld [vmem:[%s1525_s1 + $0x90] sm:$0xff] }
  0x14   :  { %337 = vmatpush.msra.mxu3 %v111_v35  ;;  %317 = vmatpush.msra.mxu2 %v110_v36  ;;  %v44_v57 = vld [vmem:[%s1525_s1 + $0x100] sm:$0xff]  ;;  %v29_v58 = vld [vmem:[%s1525_s1 + $0x88] sm:$0xff]  ;;  %v15_v59 = vld [vmem:[%s1525_s1 + $0x18] sm:$0xff] }
  0x15   :  { %297 = vmatpush.msra.mxu1 %v109_v38  ;;  %277 = vmatpush.msra.mxu0 %v108_v41  ;;  %v14_v60 = vld [vmem:[%s1525_s1 + $0x10] sm:$0xff]  ;;  %v259_v61 = vld [vmem:[%s1525_s1 + $0x7b8] sm:$0xff]  ;;  %v28_v63 = vld [vmem:[%s1525_s1 + $0x80] sm:$0xff] }
  0x16   :  { %338 = vmatpush.msra.mxu3 %v95_v39  ;;  %318 = vmatpush.msra.mxu2 %v94_v40  ;;  %v258_v62 = vld [vmem:[%s1525_s1 + $0x7b0] sm:$0xff]  ;;  %v13_v0 = vld [vmem:[%s1525_s1 + $0x8] sm:$0xff]  ;;  %v243_v1 = vld [vmem:[%s1525_s1 + $0x738] sm:$0xff] }
  0x17   :  { %298 = vmatpush.msra.mxu1 %v93_v42  ;;  %278 = vmatpush.msra.mxu0 %v92_v45  ;;  %v242_v2 = vld [vmem:[%s1525_s1 + $0x730] sm:$0xff]  ;;  %v257_v3 = vld [vmem:[%s1525_s1 + $0x7a8] sm:$0xff]  ;;  %v12_v4 = vld [vmem:[%s1525_s1] sm:$0xff] }
  0x18   :  { %339 = vmatpush.msra.mxu3 %v79_v43  ;;  %319 = vmatpush.msra.mxu2 %v78_v44  ;;  %v227_v5 = vld [vmem:[%s1525_s1 + $0x6b8] sm:$0xff]  ;;  %v226_v6 = vld [vmem:[%s1525_s1 + $0x6b0] sm:$0xff]  ;;  %v256_v7 = vld [vmem:[%s1525_s1 + $0x7a0] sm:$0xff] }
  0x19   :  { %299 = vmatpush.msra.mxu1 %v77_v46  ;;  %279 = vmatpush.msra.mxu0 %v76_v49  ;;  %v241_v8 = vld [vmem:[%s1525_s1 + $0x728] sm:$0xff]  ;;  %v211_v9 = vld [vmem:[%s1525_s1 + $0x638] sm:$0xff]  ;;  %v210_v10 = vld [vmem:[%s1525_s1 + $0x630] sm:$0xff] }
  0x1a   :  { %340 = vmatpush.msra.mxu3 %v63_v47  ;;  %320 = vmatpush.msra.mxu2 %v62_v48  ;;  %v240_v11 = vld [vmem:[%s1525_s1 + $0x720] sm:$0xff]  ;;  %v225_v12 = vld [vmem:[%s1525_s1 + $0x6a8] sm:$0xff]  ;;  %v195_v13 = vld [vmem:[%s1525_s1 + $0x5b8] sm:$0xff] }
  0x1b   :  { %300 = vmatpush.msra.mxu1 %v61_v50  ;;  %280 = vmatpush.msra.mxu0 %v60_v53  ;;  %v194_v14 = vld [vmem:[%s1525_s1 + $0x5b0] sm:$0xff]  ;;  %v224_v15 = vld [vmem:[%s1525_s1 + $0x6a0] sm:$0xff]  ;;  %v209_v16 = vld [vmem:[%s1525_s1 + $0x628] sm:$0xff] }
  0x1c   :  { %341 = vmatpush.msra.mxu3 %v47_v51  ;;  %321 = vmatpush.msra.mxu2 %v46_v52  ;;  %v179_v17 = vld [vmem:[%s1525_s1 + $0x538] sm:$0xff]  ;;  %v178_v18 = vld [vmem:[%s1525_s1 + $0x530] sm:$0xff]  ;;  %v208_v19 = vld [vmem:[%s1525_s1 + $0x620] sm:$0xff] }
  0x1d   :  { %301 = vmatpush.msra.mxu1 %v45_v54  ;;  %281 = vmatpush.msra.mxu0 %v44_v57  ;;  %v193_v20 = vld [vmem:[%s1525_s1 + $0x5a8] sm:$0xff]  ;;  %v163_v21 = vld [vmem:[%s1525_s1 + $0x4b8] sm:$0xff]  ;;  %v162_v22 = vld [vmem:[%s1525_s1 + $0x4b0] sm:$0xff] }
  0x1e   :  { %342 = vmatpush.msra.mxu3 %v31_v55  ;;  %322 = vmatpush.msra.mxu2 %v30_v56  ;;  %v192_v23 = vld [vmem:[%s1525_s1 + $0x5a0] sm:$0xff]  ;;  %v177_v24 = vld [vmem:[%s1525_s1 + $0x528] sm:$0xff]  ;;  %v147_v25 = vld [vmem:[%s1525_s1 + $0x438] sm:$0xff] }
  0x1f   :  { %302 = vmatpush.msra.mxu1 %v29_v58  ;;  %282 = vmatpush.msra.mxu0 %v28_v63  ;;  %v146_v26 = vld [vmem:[%s1525_s1 + $0x430] sm:$0xff]  ;;  %v176_v27 = vld [vmem:[%s1525_s1 + $0x520] sm:$0xff]  ;;  %v161_v28 = vld [vmem:[%s1525_s1 + $0x4a8] sm:$0xff] }
  0x20   :  { %343 = vmatpush.msra.mxu3 %v15_v59  ;;  %323 = vmatpush.msra.mxu2 %v14_v60  ;;  %v131_v29 = vld [vmem:[%s1525_s1 + $0x3b8] sm:$0xff]  ;;  %v130_v30 = vld [vmem:[%s1525_s1 + $0x3b0] sm:$0xff]  ;;  %v160_v31 = vld [vmem:[%s1525_s1 + $0x4a0] sm:$0xff] }
  0x21   :  { %303 = vmatpush.msra.mxu1 %v13_v0  ;;  %283 = vmatpush.msra.mxu0 %v12_v4  ;;  %v145_v32 = vld [vmem:[%s1525_s1 + $0x428] sm:$0xff]  ;;  %v115_v33 = vld [vmem:[%s1525_s1 + $0x338] sm:$0xff]  ;;  %v114_v34 = vld [vmem:[%s1525_s1 + $0x330] sm:$0xff] }
  0x22   :  { %408 = vmatpush.msrb.mxu3 %v259_v61  ;;  %388 = vmatpush.msrb.mxu2 %v258_v62  ;;  %v144_v35 = vld [vmem:[%s1525_s1 + $0x420] sm:$0xff]  ;;  %v129_v36 = vld [vmem:[%s1525_s1 + $0x3a8] sm:$0xff]  ;;  %v99_v37 = vld [vmem:[%s1525_s1 + $0x2b8] sm:$0xff] }
  0x23   :  { %368 = vmatpush.msrb.mxu1 %v257_v3  ;;  %348 = vmatpush.msrb.mxu0 %v256_v7  ;;  %v98_v38 = vld [vmem:[%s1525_s1 + $0x2b0] sm:$0xff]  ;;  %v128_v39 = vld [vmem:[%s1525_s1 + $0x3a0] sm:$0xff]  ;;  %v113_v40 = vld [vmem:[%s1525_s1 + $0x328] sm:$0xff] }
  0x24   :  { %409 = vmatpush.msrb.mxu3 %v243_v1  ;;  %389 = vmatpush.msrb.mxu2 %v242_v2  ;;  %v83_v41 = vld [vmem:[%s1525_s1 + $0x238] sm:$0xff]  ;;  %v82_v42 = vld [vmem:[%s1525_s1 + $0x230] sm:$0xff]  ;;  %v112_v43 = vld [vmem:[%s1525_s1 + $0x320] sm:$0xff] }
  0x25   :  { %369 = vmatpush.msrb.mxu1 %v241_v8  ;;  %349 = vmatpush.msrb.mxu0 %v240_v11  ;;  %v97_v44 = vld [vmem:[%s1525_s1 + $0x2a8] sm:$0xff]  ;;  %v67_v45 = vld [vmem:[%s1525_s1 + $0x1b8] sm:$0xff]  ;;  %v66_v46 = vld [vmem:[%s1525_s1 + $0x1b0] sm:$0xff] }
  0x26   :  { %410 = vmatpush.msrb.mxu3 %v227_v5  ;;  %390 = vmatpush.msrb.mxu2 %v226_v6  ;;  %v96_v47 = vld [vmem:[%s1525_s1 + $0x2a0] sm:$0xff]  ;;  %v81_v48 = vld [vmem:[%s1525_s1 + $0x228] sm:$0xff]  ;;  %v51_v49 = vld [vmem:[%s1525_s1 + $0x138] sm:$0xff] }
  0x27   :  { %370 = vmatpush.msrb.mxu1 %v225_v12  ;;  %350 = vmatpush.msrb.mxu0 %v224_v15  ;;  %v50_v50 = vld [vmem:[%s1525_s1 + $0x130] sm:$0xff]  ;;  %v80_v51 = vld [vmem:[%s1525_s1 + $0x220] sm:$0xff]  ;;  %v65_v52 = vld [vmem:[%s1525_s1 + $0x1a8] sm:$0xff] }
  0x28   :  { %411 = vmatpush.msrb.mxu3 %v211_v9  ;;  %391 = vmatpush.msrb.mxu2 %v210_v10  ;;  %v35_v53 = vld [vmem:[%s1525_s1 + $0xb8] sm:$0xff]  ;;  %v34_v54 = vld [vmem:[%s1525_s1 + $0xb0] sm:$0xff]  ;;  %v1064_v55 = vld [vmem:[%s1526_s0] sm:$0x7] }
  0x29   :  { %371 = vmatpush.msrb.mxu1 %v209_v16  ;;  %351 = vmatpush.msrb.mxu0 %v208_v19  ;;  %v64_v56 = vld [vmem:[%s1525_s1 + $0x1a0] sm:$0xff]  ;;  %v19_v57 = vld [vmem:[%s1525_s1 + $0x38] sm:$0xff]  ;;  %v49_v58 = vld [vmem:[%s1525_s1 + $0x128] sm:$0xff] }
  0x2a   :  { %412 = vmatpush.msrb.mxu3 %v195_v13  ;;  %392 = vmatpush.msrb.mxu2 %v194_v14  ;;  %v263_v59 = vld [vmem:[%s1525_s1 + $0x7d8] sm:$0xff]  ;;  %v18_v60 = vld [vmem:[%s1525_s1 + $0x30] sm:$0xff]  ;;  %v48_v61 = vld [vmem:[%s1525_s1 + $0x120] sm:$0xff] }
  0x2b   :  { %372 = vmatpush.msrb.mxu1 %v193_v20  ;;  %352 = vmatpush.msrb.mxu0 %v192_v23  ;;  %v262_v62 = vld [vmem:[%s1525_s1 + $0x7d0] sm:$0xff]  ;;  %v247_v63 = vld [vmem:[%s1525_s1 + $0x758] sm:$0xff]  ;;  %v33_v0 = vld [vmem:[%s1525_s1 + $0xa8] sm:$0xff] }
  0x2c   :  { %413 = vmatpush.msrb.mxu3 %v179_v17  ;;  %393 = vmatpush.msrb.mxu2 %v178_v18  ;;  %v32_v1 = vld [vmem:[%s1525_s1 + $0xa0] sm:$0xff]  ;;  %v246_v2 = vld [vmem:[%s1525_s1 + $0x750] sm:$0xff]  ;;  %v231_v3 = vld [vmem:[%s1525_s1 + $0x6d8] sm:$0xff] }
  0x2d   :  { %373 = vmatpush.msrb.mxu1 %v177_v24  ;;  %353 = vmatpush.msrb.mxu0 %v176_v27  ;;  %v17_v4 = vld [vmem:[%s1525_s1 + $0x28] sm:$0xff]  ;;  %v16_v5 = vld [vmem:[%s1525_s1 + $0x20] sm:$0xff]  ;;  %v230_v6 = vld [vmem:[%s1525_s1 + $0x6d0] sm:$0xff] }
  0x2e   :  { %414 = vmatpush.msrb.mxu3 %v163_v21  ;;  %394 = vmatpush.msrb.mxu2 %v162_v22  ;;  %v261_v7 = vld [vmem:[%s1525_s1 + $0x7c8] sm:$0xff]  ;;  %v215_v8 = vld [vmem:[%s1525_s1 + $0x658] sm:$0xff]  ;;  %v214_v9 = vld [vmem:[%s1525_s1 + $0x650] sm:$0xff] }
  0x2f   :  { %374 = vmatpush.msrb.mxu1 %v161_v28  ;;  %354 = vmatpush.msrb.mxu0 %v160_v31  ;;  %v260_v10 = vld [vmem:[%s1525_s1 + $0x7c0] sm:$0xff]  ;;  %v245_v11 = vld [vmem:[%s1525_s1 + $0x748] sm:$0xff]  ;;  %v199_v12 = vld [vmem:[%s1525_s1 + $0x5d8] sm:$0xff] }
  0x30   :  { %415 = vmatpush.msrb.mxu3 %v147_v25  ;;  %395 = vmatpush.msrb.mxu2 %v146_v26  ;;  %v198_v13 = vld [vmem:[%s1525_s1 + $0x5d0] sm:$0xff]  ;;  %v244_v14 = vld [vmem:[%s1525_s1 + $0x740] sm:$0xff]  ;;  %v229_v15 = vld [vmem:[%s1525_s1 + $0x6c8] sm:$0xff] }
  0x31   :  { %375 = vmatpush.msrb.mxu1 %v145_v32  ;;  %355 = vmatpush.msrb.mxu0 %v144_v35  ;;  %v183_v16 = vld [vmem:[%s1525_s1 + $0x558] sm:$0xff]  ;;  %v182_v17 = vld [vmem:[%s1525_s1 + $0x550] sm:$0xff]  ;;  %v228_v18 = vld [vmem:[%s1525_s1 + $0x6c0] sm:$0xff] }
  0x32   :  { %416 = vmatpush.msrb.mxu3 %v131_v29  ;;  %396 = vmatpush.msrb.mxu2 %v130_v30  ;;  %v213_v19 = vld [vmem:[%s1525_s1 + $0x648] sm:$0xff]  ;;  %v167_v20 = vld [vmem:[%s1525_s1 + $0x4d8] sm:$0xff]  ;;  %v166_v21 = vld [vmem:[%s1525_s1 + $0x4d0] sm:$0xff] }
  0x33   :  { %376 = vmatpush.msrb.mxu1 %v129_v36  ;;  %356 = vmatpush.msrb.mxu0 %v128_v39  ;;  %v212_v22 = vld [vmem:[%s1525_s1 + $0x640] sm:$0xff]  ;;  %v197_v23 = vld [vmem:[%s1525_s1 + $0x5c8] sm:$0xff]  ;;  %v151_v24 = vld [vmem:[%s1525_s1 + $0x458] sm:$0xff] }
  0x34   :  { %417 = vmatpush.msrb.mxu3 %v115_v33  ;;  %397 = vmatpush.msrb.mxu2 %v114_v34  ;;  %v150_v25 = vld [vmem:[%s1525_s1 + $0x450] sm:$0xff]  ;;  %v196_v26 = vld [vmem:[%s1525_s1 + $0x5c0] sm:$0xff]  ;;  %v181_v27 = vld [vmem:[%s1525_s1 + $0x548] sm:$0xff] }
  0x35   :  { %377 = vmatpush.msrb.mxu1 %v113_v40  ;;  %357 = vmatpush.msrb.mxu0 %v112_v43  ;;  %v135_v28 = vld [vmem:[%s1525_s1 + $0x3d8] sm:$0xff]  ;;  %v134_v29 = vld [vmem:[%s1525_s1 + $0x3d0] sm:$0xff]  ;;  %v180_v30 = vld [vmem:[%s1525_s1 + $0x540] sm:$0xff] }
  0x36   :  { %418 = vmatpush.msrb.mxu3 %v99_v37  ;;  %398 = vmatpush.msrb.mxu2 %v98_v38  ;;  %v165_v31 = vld [vmem:[%s1525_s1 + $0x4c8] sm:$0xff]  ;;  %v119_v32 = vld [vmem:[%s1525_s1 + $0x358] sm:$0xff]  ;;  %v118_v33 = vld [vmem:[%s1525_s1 + $0x350] sm:$0xff] }
  0x37   :  { %378 = vmatpush.msrb.mxu1 %v97_v44  ;;  %358 = vmatpush.msrb.mxu0 %v96_v47  ;;  %v164_v34 = vld [vmem:[%s1525_s1 + $0x4c0] sm:$0xff]  ;;  %v149_v35 = vld [vmem:[%s1525_s1 + $0x448] sm:$0xff]  ;;  %v103_v36 = vld [vmem:[%s1525_s1 + $0x2d8] sm:$0xff] }
  0x38   :  { %419 = vmatpush.msrb.mxu3 %v83_v41  ;;  %399 = vmatpush.msrb.mxu2 %v82_v42  ;;  %v102_v37 = vld [vmem:[%s1525_s1 + $0x2d0] sm:$0xff]  ;;  %v148_v38 = vld [vmem:[%s1525_s1 + $0x440] sm:$0xff]  ;;  %v133_v39 = vld [vmem:[%s1525_s1 + $0x3c8] sm:$0xff] }
  0x39   :  { %379 = vmatpush.msrb.mxu1 %v81_v48  ;;  %359 = vmatpush.msrb.mxu0 %v80_v51  ;;  %v87_v40 = vld [vmem:[%s1525_s1 + $0x258] sm:$0xff]  ;;  %v86_v41 = vld [vmem:[%s1525_s1 + $0x250] sm:$0xff]  ;;  %v132_v42 = vld [vmem:[%s1525_s1 + $0x3c0] sm:$0xff] }
  0x3a   :  { %420 = vmatpush.msrb.mxu3 %v67_v45  ;;  %400 = vmatpush.msrb.mxu2 %v66_v46  ;;  %v117_v43 = vld [vmem:[%s1525_s1 + $0x348] sm:$0xff]  ;;  %v71_v44 = vld [vmem:[%s1525_s1 + $0x1d8] sm:$0xff]  ;;  %v70_v45 = vld [vmem:[%s1525_s1 + $0x1d0] sm:$0xff] }
  0x3b   :  { %380 = vmatpush.msrb.mxu1 %v65_v52  ;;  %344 = vmatmul.f32.vlgmr.msra.gmra.mxu3 %v1064_v55  ;;  %v116_v46 = vld [vmem:[%s1525_s1 + $0x340] sm:$0xff]  ;;  %v101_v47 = vld [vmem:[%s1525_s1 + $0x2c8] sm:$0xff]  ;;  %v55_v48 = vld [vmem:[%s1525_s1 + $0x158] sm:$0xff] }
  0x3c   :  { %421 = vmatpush.msrb.mxu3 %v51_v49  ;;  %401 = vmatpush.msrb.mxu2 %v50_v50  ;;  %v54_v49 = vld [vmem:[%s1525_s1 + $0x150] sm:$0xff]  ;;  %v100_v50 = vld [vmem:[%s1525_s1 + $0x2c0] sm:$0xff]  ;;  %v85_v51 = vld [vmem:[%s1525_s1 + $0x248] sm:$0xff] }
  0x3d   :  { %360 = vmatpush.msrb.mxu0 %v64_v56  ;;  %381 = vmatpush.msrb.mxu1 %v49_v58  ;;  %v39_v52 = vld [vmem:[%s1525_s1 + $0xd8] sm:$0xff]  ;;  %v69_v56 = vld [vmem:[%s1525_s1 + $0x1c8] sm:$0xff]  ;;  %v22_v58 = vld [vmem:[%s1525_s1 + $0x50] sm:$0xff] }
  0x3e   :  { %422 = vmatpush.msrb.mxu3 %v35_v53  ;;  %402 = vmatpush.msrb.mxu2 %v34_v54  ;;  %v38_v53 = vld [vmem:[%s1525_s1 + $0xd0] sm:$0xff]  ;;  %v84_v54 = vld [vmem:[%s1525_s1 + $0x240] sm:$0xff] }
  0x3f   :  { %324 = vmatmul.f32.vlgmr.msra.gmra.mxu2 %v1064_v55  ;;  %361 = vmatpush.msrb.mxu0 %v48_v61  ;;  %v53_v61 = vld [vmem:[%s1525_s1 + $0x148] sm:$0xff] }
  0x40   :  { %423 = vmatpush.msrb.mxu3 %v19_v57  ;;  %403 = vmatpush.msrb.mxu2 %v18_v60  ;;  %v23_v57 = vld [vmem:[%s1525_s1 + $0x58] sm:$0xff] }
  0x41   :  { %382 = vmatpush.msrb.mxu1 %v33_v0  ;;  %362 = vmatpush.msrb.mxu0 %v32_v1  ;;  %v267_v60 = vld [vmem:[%s1525_s1 + $0x7f8] sm:$0xff]  ;;  %v37_v1 = vld [vmem:[%s1525_s1 + $0xc8] sm:$0xff] }
  0x42   :  { %488 = vmatpush.msra.mxu3 %v263_v59  ;;  %468 = vmatpush.msra.mxu2 %v262_v62  ;;  %v68_v59 = vld [vmem:[%s1525_s1 + $0x1c0] sm:$0xff]  ;;  %v251_v0 = vld [vmem:[%s1525_s1 + $0x778] sm:$0xff] }
  0x43   :  { %383 = vmatpush.msrb.mxu1 %v17_v4  ;;  %363 = vmatpush.msrb.mxu0 %v16_v5  ;;  %v52_v62 = vld [vmem:[%s1525_s1 + $0x140] sm:$0xff]  ;;  %v235_v4 = vld [vmem:[%s1525_s1 + $0x6f8] sm:$0xff]  ;;  %v21_v5 = vld [vmem:[%s1525_s1 + $0x48] sm:$0xff] }
  0x44   :  { %489 = vmatpush.msra.mxu3 %v247_v63  ;;  %469 = vmatpush.msra.mxu2 %v246_v2  ;;  %v266_v63 = vld [vmem:[%s1525_s1 + $0x7f0] sm:$0xff]  ;;  %v36_v2 = vld [vmem:[%s1525_s1 + $0xc0] sm:$0xff] }
  0x45   :  { %304 = vmatmul.f32.vlgmr.msra.gmra.mxu1 %v1064_v55  ;;  %284 = vmatmul.f32.vlgmr.msra.gmra.mxu0 %v1064_v55 }
  0x46   :  { %490 = vmatpush.msra.mxu3 %v231_v3  ;;  %470 = vmatpush.msra.mxu2 %v230_v6  ;;  %v250_v3 = vld [vmem:[%s1525_s1 + $0x770] sm:$0xff]  ;;  %v20_v6 = vld [vmem:[%s1525_s1 + $0x40] sm:$0xff] }
  0x47   :  { %448 = vmatpush.msra.mxu1 %v261_v7  ;;  %428 = vmatpush.msra.mxu0 %v260_v10  ;;  %v234_v7 = vld [vmem:[%s1525_s1 + $0x6f0] sm:$0xff] }
  0x48   :  { %491 = vmatpush.msra.mxu3 %v215_v8  ;;  %471 = vmatpush.msra.mxu2 %v214_v9  ;;  %v265_v8 = vld [vmem:[%s1525_s1 + $0x7e8] sm:$0xff]  ;;  %v219_v9 = vld [vmem:[%s1525_s1 + $0x678] sm:$0xff]  ;;  %v218_v10 = vld [vmem:[%s1525_s1 + $0x670] sm:$0xff] }
  0x49   :  { %449 = vmatpush.msra.mxu1 %v245_v11  ;;  %429 = vmatpush.msra.mxu0 %v244_v14  ;;  %v264_v11 = vld [vmem:[%s1525_s1 + $0x7e0] sm:$0xff]  ;;  %v202_v14 = vld [vmem:[%s1525_s1 + $0x5f0] sm:$0xff] }
  0x4a   :  { %492 = vmatpush.msra.mxu3 %v199_v12  ;;  %472 = vmatpush.msra.mxu2 %v198_v13  ;;  %v249_v12 = vld [vmem:[%s1525_s1 + $0x768] sm:$0xff]  ;;  %v203_v13 = vld [vmem:[%s1525_s1 + $0x5f8] sm:$0xff] }
  0x4b   :  { %450 = vmatpush.msra.mxu1 %v229_v15  ;;  %430 = vmatpush.msra.mxu0 %v228_v18  ;;  %v248_v15 = vld [vmem:[%s1525_s1 + $0x760] sm:$0xff]  ;;  %v186_v18 = vld [vmem:[%s1525_s1 + $0x570] sm:$0xff] }
  0x4c   :  { %493 = vmatpush.msra.mxu3 %v183_v16  ;;  %473 = vmatpush.msra.mxu2 %v182_v17  ;;  %v233_v16 = vld [vmem:[%s1525_s1 + $0x6e8] sm:$0xff]  ;;  %v187_v17 = vld [vmem:[%s1525_s1 + $0x578] sm:$0xff] }
  0x4d   :  { %451 = vmatpush.msra.mxu1 %v213_v19  ;;  %431 = vmatpush.msra.mxu0 %v212_v22  ;;  %v232_v19 = vld [vmem:[%s1525_s1 + $0x6e0] sm:$0xff]  ;;  %v170_v22 = vld [vmem:[%s1525_s1 + $0x4f0] sm:$0xff] }
  0x4e   :  { %494 = vmatpush.msra.mxu3 %v167_v20  ;;  %474 = vmatpush.msra.mxu2 %v166_v21  ;;  %v217_v20 = vld [vmem:[%s1525_s1 + $0x668] sm:$0xff]  ;;  %v171_v21 = vld [vmem:[%s1525_s1 + $0x4f8] sm:$0xff] }
  0x4f   :  { %452 = vmatpush.msra.mxu1 %v197_v23  ;;  %432 = vmatpush.msra.mxu0 %v196_v26  ;;  %v216_v23 = vld [vmem:[%s1525_s1 + $0x660] sm:$0xff]  ;;  %v154_v26 = vld [vmem:[%s1525_s1 + $0x470] sm:$0xff] }
  0x50   :  { %495 = vmatpush.msra.mxu3 %v151_v24  ;;  %475 = vmatpush.msra.mxu2 %v150_v25  ;;  %v201_v24 = vld [vmem:[%s1525_s1 + $0x5e8] sm:$0xff]  ;;  %v155_v25 = vld [vmem:[%s1525_s1 + $0x478] sm:$0xff] }
  0x51   :  { %453 = vmatpush.msra.mxu1 %v181_v27  ;;  %433 = vmatpush.msra.mxu0 %v180_v30  ;;  %v200_v27 = vld [vmem:[%s1525_s1 + $0x5e0] sm:$0xff]  ;;  %v138_v30 = vld [vmem:[%s1525_s1 + $0x3f0] sm:$0xff] }
  0x52   :  { %496 = vmatpush.msra.mxu3 %v135_v28  ;;  %476 = vmatpush.msra.mxu2 %v134_v29  ;;  %v185_v28 = vld [vmem:[%s1525_s1 + $0x568] sm:$0xff]  ;;  %v139_v29 = vld [vmem:[%s1525_s1 + $0x3f8] sm:$0xff] }
  0x53   :  { %454 = vmatpush.msra.mxu1 %v165_v31  ;;  %434 = vmatpush.msra.mxu0 %v164_v34  ;;  %v184_v31 = vld [vmem:[%s1525_s1 + $0x560] sm:$0xff]  ;;  %v122_v34 = vld [vmem:[%s1525_s1 + $0x370] sm:$0xff] }
  0x54   :  { %497 = vmatpush.msra.mxu3 %v119_v32  ;;  %477 = vmatpush.msra.mxu2 %v118_v33  ;;  %v169_v32 = vld [vmem:[%s1525_s1 + $0x4e8] sm:$0xff]  ;;  %v123_v33 = vld [vmem:[%s1525_s1 + $0x378] sm:$0xff] }
  0x55   :  { %455 = vmatpush.msra.mxu1 %v149_v35  ;;  %435 = vmatpush.msra.mxu0 %v148_v38  ;;  %v168_v35 = vld [vmem:[%s1525_s1 + $0x4e0] sm:$0xff]  ;;  %v106_v38 = vld [vmem:[%s1525_s1 + $0x2f0] sm:$0xff] }
  0x56   :  { %498 = vmatpush.msra.mxu3 %v103_v36  ;;  %478 = vmatpush.msra.mxu2 %v102_v37  ;;  %v153_v36 = vld [vmem:[%s1525_s1 + $0x468] sm:$0xff]  ;;  %v107_v37 = vld [vmem:[%s1525_s1 + $0x2f8] sm:$0xff] }
  0x57   :  { %456 = vmatpush.msra.mxu1 %v133_v39  ;;  %436 = vmatpush.msra.mxu0 %v132_v42  ;;  %v152_v39 = vld [vmem:[%s1525_s1 + $0x460] sm:$0xff]  ;;  %v90_v42 = vld [vmem:[%s1525_s1 + $0x270] sm:$0xff] }
  0x58   :  { %499 = vmatpush.msra.mxu3 %v87_v40  ;;  %479 = vmatpush.msra.mxu2 %v86_v41  ;;  %v137_v40 = vld [vmem:[%s1525_s1 + $0x3e8] sm:$0xff]  ;;  %v91_v41 = vld [vmem:[%s1525_s1 + $0x278] sm:$0xff] }
  0x59   :  { %457 = vmatpush.msra.mxu1 %v117_v43  ;;  %437 = vmatpush.msra.mxu0 %v116_v46  ;;  %v136_v43 = vld [vmem:[%s1525_s1 + $0x3e0] sm:$0xff] }
  0x5a   :  { %500 = vmatpush.msra.mxu3 %v71_v44  ;;  %480 = vmatpush.msra.mxu2 %v70_v45  ;;  %v121_v44 = vld [vmem:[%s1525_s1 + $0x368] sm:$0xff]  ;;  %v75_v45 = vld [vmem:[%s1525_s1 + $0x1f8] sm:$0xff]  ;;  %v120_v46 = vld [vmem:[%s1525_s1 + $0x360] sm:$0xff] }
  0x5b   :  { %458 = vmatpush.msra.mxu1 %v101_v47  ;;  %438 = vmatpush.msra.mxu0 %v100_v50  ;;  %v105_v47 = vld [vmem:[%s1525_s1 + $0x2e8] sm:$0xff]  ;;  %v104_v50 = vld [vmem:[%s1525_s1 + $0x2e0] sm:$0xff] }
  0x5c   :  { %501 = vmatpush.msra.mxu3 %v55_v48  ;;  %481 = vmatpush.msra.mxu2 %v54_v49  ;;  %v74_v48 = vld [vmem:[%s1525_s1 + $0x1f0] sm:$0xff]  ;;  %v59_v49 = vld [vmem:[%s1525_s1 + $0x178] sm:$0xff] }
  0x5d   :  { %459 = vmatpush.msra.mxu1 %v85_v51  ;;  %439 = vmatpush.msra.mxu0 %v84_v54  ;;  %v89_v51 = vld [vmem:[%s1525_s1 + $0x268] sm:$0xff]  ;;  %v88_v54 = vld [vmem:[%s1525_s1 + $0x260] sm:$0xff] }
  0x5e   :  { %502 = vmatpush.msra.mxu3 %v39_v52  ;;  %482 = vmatpush.msra.mxu2 %v38_v53  ;;  %v58_v52 = vld [vmem:[%s1525_s1 + $0x170] sm:$0xff]  ;;  %v43_v53 = vld [vmem:[%s1525_s1 + $0xf8] sm:$0xff] }
  0x5f   :  { %460 = vmatpush.msra.mxu1 %v69_v56  ;;  %424 = vmatmul.f32.vlgmr.msrb.gmra.mxu3 %v1064_v55  ;;  %v73_v56 = vld [vmem:[%s1525_s1 + $0x1e8] sm:$0xff] }
  0x60   :  { %503 = vmatpush.msra.mxu3 %v23_v57  ;;  %483 = vmatpush.msra.mxu2 %v22_v58  ;;  %v42_v57 = vld [vmem:[%s1525_s1 + $0xf0] sm:$0xff]  ;;  %v27_v58 = vld [vmem:[%s1525_s1 + $0x78] sm:$0xff] }
  0x61   :  { %440 = vmatpush.msra.mxu0 %v68_v59  ;;  %461 = vmatpush.msra.mxu1 %v53_v61  ;;  %v72_v59 = vld [vmem:[%s1525_s1 + $0x1e0] sm:$0xff]  ;;  %v26_v61 = vld [vmem:[%s1525_s1 + $0x70] sm:$0xff] }
  0x62   :  { %568 = vmatpush.msrb.mxu3 %v267_v60  ;;  %404 = vmatmul.f32.vlgmr.msrb.gmra.mxu2 %v1064_v55  ;;  %v57_v60 = vld [vmem:[%s1525_s1 + $0x168] sm:$0xff] }
  0x63   :  { %441 = vmatpush.msra.mxu0 %v52_v62  ;;  %548 = vmatpush.msrb.mxu2 %v266_v63  ;;  %v56_v62 = vld [vmem:[%s1525_s1 + $0x160] sm:$0xff]  ;;  %v41_v63 = vld [vmem:[%s1525_s1 + $0xe8] sm:$0xff] }
  0x64   :  { %569 = vmatpush.msrb.mxu3 %v251_v0  ;;  %462 = vmatpush.msra.mxu1 %v37_v1  ;;  %v40_v0 = vld [vmem:[%s1525_s1 + $0xe0] sm:$0xff]  ;;  %v25_v1 = vld [vmem:[%s1525_s1 + $0x68] sm:$0xff] }
  0x65   :  { %442 = vmatpush.msra.mxu0 %v36_v2  ;;  %549 = vmatpush.msrb.mxu2 %v250_v3  ;;  %v24_v2 = vld [vmem:[%s1525_s1 + $0x60] sm:$0xff] }
  0x66   :  { %570 = vmatpush.msrb.mxu3 %v235_v4  ;;  %463 = vmatpush.msra.mxu1 %v21_v5 }
  0x67   :  { %443 = vmatpush.msra.mxu0 %v20_v6  ;;  %384 = vmatmul.f32.vlgmr.msrb.gmra.mxu1 %v1064_v55 }
  0x68   :  { %550 = vmatpush.msrb.mxu2 %v234_v7  ;;  %528 = vmatpush.msrb.mxu1 %v265_v8 }
  0x69   :  { %571 = vmatpush.msrb.mxu3 %v219_v9  ;;  %364 = vmatmul.f32.vlgmr.msrb.gmra.mxu0 %v1064_v55 }
  0x6a   :  { %551 = vmatpush.msrb.mxu2 %v218_v10  ;;  %508 = vmatpush.msrb.mxu0 %v264_v11 }
  0x6b   :  { %529 = vmatpush.msrb.mxu1 %v249_v12  ;;  %572 = vmatpush.msrb.mxu3 %v203_v13 }
  0x6c   :  { %552 = vmatpush.msrb.mxu2 %v202_v14  ;;  %509 = vmatpush.msrb.mxu0 %v248_v15 }
  0x6d   :  { %530 = vmatpush.msrb.mxu1 %v233_v16  ;;  %573 = vmatpush.msrb.mxu3 %v187_v17 }
  0x6e   :  { %553 = vmatpush.msrb.mxu2 %v186_v18  ;;  %510 = vmatpush.msrb.mxu0 %v232_v19 }
  0x6f   :  { %531 = vmatpush.msrb.mxu1 %v217_v20  ;;  %574 = vmatpush.msrb.mxu3 %v171_v21 }
  0x70   :  { %554 = vmatpush.msrb.mxu2 %v170_v22  ;;  %511 = vmatpush.msrb.mxu0 %v216_v23 }
  0x71   :  { %532 = vmatpush.msrb.mxu1 %v201_v24  ;;  %575 = vmatpush.msrb.mxu3 %v155_v25 }
  0x72   :  { %555 = vmatpush.msrb.mxu2 %v154_v26  ;;  %512 = vmatpush.msrb.mxu0 %v200_v27 }
  0x73   :  { %533 = vmatpush.msrb.mxu1 %v185_v28  ;;  %576 = vmatpush.msrb.mxu3 %v139_v29 }
  0x74   :  { %556 = vmatpush.msrb.mxu2 %v138_v30  ;;  %513 = vmatpush.msrb.mxu0 %v184_v31 }
  0x75   :  { %534 = vmatpush.msrb.mxu1 %v169_v32  ;;  %577 = vmatpush.msrb.mxu3 %v123_v33 }
  0x76   :  { %557 = vmatpush.msrb.mxu2 %v122_v34  ;;  %514 = vmatpush.msrb.mxu0 %v168_v35 }
  0x77   :  { %535 = vmatpush.msrb.mxu1 %v153_v36  ;;  %578 = vmatpush.msrb.mxu3 %v107_v37 }
  0x78   :  { %558 = vmatpush.msrb.mxu2 %v106_v38  ;;  %515 = vmatpush.msrb.mxu0 %v152_v39 }
  0x79   :  { %536 = vmatpush.msrb.mxu1 %v137_v40  ;;  %579 = vmatpush.msrb.mxu3 %v91_v41 }
  0x7a   :  { %559 = vmatpush.msrb.mxu2 %v90_v42  ;;  %504 = vmatmul.f32.vlgmr.msra.gmra.mxu3 %v1064_v55 }
  0x7b   :  { %516 = vmatpush.msrb.mxu0 %v136_v43  ;;  %537 = vmatpush.msrb.mxu1 %v121_v44 }
  0x7c   :  { %580 = vmatpush.msrb.mxu3 %v75_v45  ;;  %484 = vmatmul.f32.vlgmr.msra.gmra.mxu2 %v1064_v55 }
  0x7d   :  { %517 = vmatpush.msrb.mxu0 %v120_v46  ;;  %538 = vmatpush.msrb.mxu1 %v105_v47 }
  0x7e   :  { %560 = vmatpush.msrb.mxu2 %v74_v48  ;;  %581 = vmatpush.msrb.mxu3 %v59_v49 }
  0x7f   :  { %518 = vmatpush.msrb.mxu0 %v104_v50  ;;  %539 = vmatpush.msrb.mxu1 %v89_v51 }
  0x80   :  { %561 = vmatpush.msrb.mxu2 %v58_v52  ;;  %582 = vmatpush.msrb.mxu3 %v43_v53 }
  0x81   :  { %464 = vmatmul.f32.vlgmr.msra.gmra.mxu1 %v1064_v55  ;;  %519 = vmatpush.msrb.mxu0 %v88_v54 }
  0x82   :  { %540 = vmatpush.msrb.mxu1 %v73_v56  ;;  %562 = vmatpush.msrb.mxu2 %v42_v57 }
  0x83   :  { %583 = vmatpush.msrb.mxu3 %v27_v58  ;;  %444 = vmatmul.f32.vlgmr.msra.gmra.mxu0 %v1064_v55 }
  0x84   :  { %584 = vmatmul.f32.vlgmr.msrb.gmra.mxu3 %v1064_v55  ;;  %520 = vmatpush.msrb.mxu0 %v72_v59 }
  0x85   :  { %541 = vmatpush.msrb.mxu1 %v57_v60  ;;  %563 = vmatpush.msrb.mxu2 %v26_v61 }
  0x86   :  { %564 = vmatmul.f32.vlgmr.msrb.gmra.mxu2 %v1064_v55  ;;  %521 = vmatpush.msrb.mxu0 %v56_v62 }
  0x87   :  { %542 = vmatpush.msrb.mxu1 %v41_v63 }
  0x88   :  { %522 = vmatpush.msrb.mxu0 %v40_v0 }
  0x89   :  { %543 = vmatpush.msrb.mxu1 %v25_v1 }
  0x8a   :  { %544 = vmatmul.f32.vlgmr.msrb.gmra.mxu1 %v1064_v55  ;;  %523 = vmatpush.msrb.mxu0 %v24_v2 }
  0x8b   :  { %524 = vmatmul.f32.vlgmr.msrb.gmra.mxu0 %v1064_v55 }
  0xbe   :  { %v345_v3 = vpop.f32.mrf.mxu3 }
  0xbf   :  { %657 = vtanh.f32 %v345_v3 }
  0xc2   :  { %v305_v4 = vpop.f32.mrf.mxu1  ;;  %v325_v5 = vpop.f32.mrf.mxu2 }
  0xc3   :  { %659 = vtanh.f32 %v305_v4  ;;  %v285_v6 = vpop.f32.mrf.mxu0 }
  0xc4   :  { %661 = vtanh.f32 %v325_v5 }
  0xc5   :  { %663 = vtanh.f32 %v285_v6  ;;  %v658_v7 = vpop.eup %657 }
  0xc6   :  { %v621_v8 = vrot.slane %v658_v7, 4 }
  0xc9   :  { %v660_v9 = vpop.eup %659 }
  0xca   :  { %v662_v10 = vpop.eup %661  ;;  %v620_v11 = vrot.slane %v660_v9, 4 }
  0xcb   :  { %v664_v12 = vpop.eup %663  ;;  %v630_v13 = vsel %vm628_vm0, %v662_v10, %v621_v8 }
  0xcc   :  { %v629_v14 = vsel %vm628_vm0, %v664_v12, %v620_v11  ;;  %646 = vst [vmem:[%s1527_s2 + $0x8] sm:$0x77] %v630_v13 }
  0xcd   :  { %645 = vst [vmem:[%s1527_s2] sm:$0x77] %v629_v14 }
  0xe2   :  { %v425_v55 = vpop.f32.mrf.mxu3 }
  0xe3   :  { %665 = vtanh.f32 %v425_v55 }
  0xe4   :  { %v385_v15 = vpop.f32.mrf.mxu1 }
  0xe5   :  { %667 = vtanh.f32 %v385_v15  ;;  %v405_v16 = vpop.f32.mrf.mxu2 }
  0xe6   :  { %v365_v17 = vpop.f32.mrf.mxu0  ;;  %669 = vtanh.f32 %v405_v16 }
  0xe7   :  { %671 = vtanh.f32 %v365_v17 }
  0xe9   :  { %v666_v18 = vpop.eup %665 }
  0xea   :  { %v623_v20 = vrot.slane %v666_v18, 4 }
  0xeb   :  { %v668_v19 = vpop.eup %667 }
  0xec   :  { %v670_v21 = vpop.eup %669  ;;  %v622_v22 = vrot.slane %v668_v19, 4 }
  0xed   :  { %v672_v23 = vpop.eup %671  ;;  %v632_v24 = vsel %vm628_vm0, %v670_v21, %v623_v20 }
  0xee   :  { %v631_v25 = vsel %vm628_vm0, %v672_v23, %v622_v22  ;;  %648 = vst [vmem:[%s1527_s2 + $0x18] sm:$0x77] %v632_v24 }
  0xef   :  { %647 = vst [vmem:[%s1527_s2 + $0x10] sm:$0x77] %v631_v25 }
  0xfd   :  { %v505_v27 = vpop.f32.mrf.mxu3 }
  0xfe   :  { %v465_v26 = vpop.f32.mrf.mxu1 }
  0xff   :  { %673 = vtanh.f32 %v465_v26  ;;  %v485_v28 = vpop.f32.mrf.mxu2 }
 0x100   :  { %675 = vtanh.f32 %v505_v27  ;;  %v445_v29 = vpop.f32.mrf.mxu0 }
 0x101   :  { %677 = vtanh.f32 %v485_v28 }
 0x102   :  { %679 = vtanh.f32 %v445_v29 }
 0x105   :  { %v674_v30 = vpop.eup %673 }
 0x106   :  { %v676_v31 = vpop.eup %675  ;;  %v624_v32 = vrot.slane %v674_v30, 4 }
 0x107   :  { %v678_v33 = vpop.eup %677  ;;  %v625_v34 = vrot.slane %v676_v31, 4  ;;  %v585_v35 = vpop.f32.mrf.mxu3 }
 0x108   :  { %v680_v36 = vpop.eup %679  ;;  %v545_v37 = vpop.f32.mrf.mxu1  ;;  %681 = vtanh.f32 %v585_v35 }
 0x109   :  { %v633_v38 = vsel %vm628_vm0, %v680_v36, %v624_v32  ;;  %v634_v39 = vsel %vm628_vm0, %v678_v33, %v625_v34  ;;  %683 = vtanh.f32 %v545_v37  ;;  %v525_v40 = vpop.f32.mrf.mxu0  ;;  %v565_v41 = vpop.f32.mrf.mxu2 }
 0x10a   :  { %649 = vst [vmem:[%s1527_s2 + $0x20] sm:$0x77] %v633_v38  ;;  %685 = vtanh.f32 %v525_v40 }
 0x10b   :  { %650 = vst [vmem:[%s1527_s2 + $0x28] sm:$0x77] %v634_v39  ;;  %687 = vtanh.f32 %v565_v41 }
 0x10e   :  { %v682_v42 = vpop.eup %681 }
 0x10f   :  { %v684_v43 = vpop.eup %683  ;;  %v627_v44 = vrot.slane %v682_v42, 4 }
 0x110   :  { %v686_v45 = vpop.eup %685  ;;  %v626_v46 = vrot.slane %v684_v43, 4 }
 0x111   :  { %v688_v47 = vpop.eup %687 }
 0x112   :  { %v635_v48 = vsel %vm628_vm0, %v686_v45, %v626_v46  ;;  %v636_v49 = vsel %vm628_vm0, %v688_v47, %v627_v44 }
 0x113   :  { %651 = vst [vmem:[%s1527_s2 + $0x30] sm:$0x77] %v635_v48 }
 0x114   :  { %652 = vst [vmem:[%s1527_s2 + $0x38] sm:$0x77] %v636_v49 }

</bundles_post_ra>
